<compile_context>
chip_gen: v5e
topology: v5e:2x2
jax: 0.10.0
libtpu: 0.0.40
codegen_flags: <defaults>
</compile_context>

<pallas_src>
import math
import functools

import jax
import jax.numpy as jnp
from jax.experimental import pallas as pl
from jax.experimental.pallas import tpu as pltpu


def _dra_kernel(doc_ref, rel_ref,
                wdoc_ref, wrel_ref, wfd_ref, wfr_ref,
                gd_ref, bd_ref, gr_ref, br_ref,
                doc_out_ref, rel_out_ref,
                *, n_head, d_k, d_v, d_model, d_pad, ln_eps):
    f32 = jnp.float32
    bf16 = jnp.bfloat16

    doc = doc_ref[0]                         # (Ld, Dp) bf16
    rel = rel_ref[0]                         # (Nr, Dp) bf16

    hdk = n_head * d_k
    hdv = n_head * d_v
    scale = 1.0 / math.sqrt(d_k)
    contract_last = (((1,), (1,)), ((), ()))   # contract dim -1 of both operands

    # ---- all-head input projections: 2 lane-dense MXU matmuls --------------
    # wdoc = [Wq * 1/sqrt(d_k) | Wkd | Wvd]   -> (Ld, 2*H*d_k + H*d_v)
    # wrel = [Wkr | Wvr]                      -> (Nr, H*d_k + H*d_v)
    proj_doc = jnp.dot(doc, wdoc_ref[...], preferred_element_type=f32)
    proj_rel = jnp.dot(rel, wrel_ref[...], preferred_element_type=f32)

    q_all = proj_doc[:, 0 * hdk:1 * hdk]          # pre-scaled by 1/sqrt(d_k)
    kd_all = proj_doc[:, 1 * hdk:2 * hdk]
    vd_all = proj_doc[:, 2 * hdk:2 * hdk + hdv]
    kr_all = proj_rel[:, 0:hdk]
    vr_all = proj_rel[:, hdk:hdk + hdv]

    def softmax_rows(s):
        m = jnp.max(s, axis=-1, keepdims=True)
        p = jnp.exp(s - m)
        # Exact reciprocal: hidden under the surrounding MXU work, tighter
        # parity with the torch reference than the approx EUP path.
        return p * pl.reciprocal(jnp.sum(p, axis=-1, keepdims=True))

    # ---- per-head attention (static unrolled loop; all slices are static) --
    psi_i_parts = []
    psi_r_parts = []
    for h in range(n_head):
        k_sl = slice(h * d_k, (h + 1) * d_k)
        v_sl = slice(h * d_v, (h + 1) * d_v)
        qh = q_all[:, k_sl]                  # (Ld, dk) f32, already scaled
        kdh = kd_all[:, k_sl]                # (Ld, dk)
        vdh = vd_all[:, v_sl]                # (Ld, dv)
        krh = kr_all[:, k_sl]                # (Nr, dk)
        vrh = vr_all[:, v_sl]                # (Nr, dv)

        # fused key / value: doc side + sum over all relations
        fused_k = kdh + jnp.sum(krh, axis=0, keepdims=True)     # (Ld, dk)
        fused_v = vdh + jnp.sum(vrh, axis=0, keepdims=True)     # (Ld, dv)

        # doc -> doc attention
        s_dd = jax.lax.dot_general(qh.astype(bf16), fused_k.astype(bf16),
                                   contract_last, preferred_element_type=f32)
        a_dd = softmax_rows(s_dd)                                # (Ld, Ld)
        psi_i_parts.append(
            jnp.dot(a_dd.astype(bf16), fused_v.astype(bf16),
                    preferred_element_type=f32))                 # (Ld, dv)

        # relation -> doc attention: all relations at once (row-wise softmax is
        # identical to the per-relation torch loop).  The softmax scale lives in
        # a tiny scaled copy of krh; the unscaled krh feeds fused_k above.
        krh_s = krh * scale
        s_rd = jax.lax.dot_general(krh_s.astype(bf16), kdh.astype(bf16),
                                   contract_last, preferred_element_type=f32)
        a_rd = softmax_rows(s_rd)                                # (Nr, Ld)
        psi_r_parts.append(
            jnp.dot(a_rd.astype(bf16), vdh.astype(bf16),
                    preferred_element_type=f32) + vrh)           # (Nr, dv)

    psi_i = jnp.concatenate(psi_i_parts, axis=-1)                # (Ld, H*dv)
    psi_r = jnp.concatenate(psi_r_parts, axis=-1)                # (Nr, H*dv)

    # ---- fused output projections: single K = H*d_v deep matmuls + residual -
    x_doc = jnp.dot(psi_i.astype(bf16), wfd_ref[...],
                    preferred_element_type=f32) + doc.astype(f32)
    x_rel = jnp.dot(psi_r.astype(bf16), wfr_ref[...],
                    preferred_element_type=f32) + rel.astype(f32)

    # ---- LayerNorm: two-pass variance, padded lanes masked out --------------
    inv_d = 1.0 / d_model
    if d_pad != d_model:
        lane = jax.lax.broadcasted_iota(jnp.int32, (1, d_pad), 1)
        lane_mask = (lane < d_model).astype(f32)
    else:
        lane_mask = None

    def layer_norm(x, gamma, beta):
        mu = jnp.sum(x, axis=-1, keepdims=True) * inv_d   # padded lanes are 0
        xc = x - mu
        if lane_mask is not None:
            xc = xc * lane_mask                            # keep pads out of var
        var = jnp.sum(xc * xc, axis=-1, keepdims=True) * inv_d
        return xc * jax.lax.rsqrt(var + ln_eps) * gamma + beta

    doc_out_ref[0] = layer_norm(x_doc, gd_ref[...], bd_ref[...]).astype(doc_out_ref.dtype)
    rel_out_ref[0] = layer_norm(x_rel, gr_ref[...], br_ref[...]).astype(rel_out_ref.dtype)


def document_relation_attention(doc_input, rel_input, params,
                                *, n_head, d_k, d_v,
                                smoothing_factor=1e-6, ln_eps=1e-6):
    # Adding a constant to every attention score is a no-op under softmax
    # (mask=None path), so `smoothing_factor` is not used in the kernel.
    del smoothing_factor

    B, Ld, D = doc_input.shape
    _, Nr, _ = rel_input.shape

    f32 = jnp.float32
    bf16 = jnp.bfloat16

    # ---- lane-dense padding of d_model --------------------------------------
    Dp = max(128, ((D + 127) // 128) * 128)
    pad = Dp - D

    def pad_last(x):
        if pad == 0:
            return x
        return jnp.pad(x, [(0, 0)] * (x.ndim - 1) + [(0, pad)])

    def pad_rows(w):
        if pad == 0:
            return w
        return jnp.pad(w, [(0, pad), (0, 0)])

    doc_p = pad_last(doc_input).astype(bf16)            # (B, Ld, Dp)
    rel_p = pad_last(rel_input).astype(bf16)            # (B, Nr, Dp)

    scale = 1.0 / math.sqrt(d_k)
    # Concatenated input projections (one matmul per stream), scale folded in Wq.
    w_doc = pad_rows(jnp.concatenate(
        [params["wq"] * scale, params["wkd"], params["wvd"]], axis=1)).astype(bf16)
    w_rel = pad_rows(jnp.concatenate(
        [params["wkr"], params["wvr"]], axis=1)).astype(bf16)
    # Full (un-split) output projections: (H*d_v, Dp), zero-padded output cols.
    wfd = pad_last(params["wfd"]).astype(bf16)
    wfr = pad_last(params["wfr"]).astype(bf16)

    gd = pad_last(params["gd"].reshape(1, D)).astype(f32)
    bd = pad_last(params["bd"].reshape(1, D)).astype(f32)
    gr = pad_last(params["gr"].reshape(1, D)).astype(f32)
    br = pad_last(params["br"].reshape(1, D)).astype(f32)

    kernel = functools.partial(_dra_kernel, n_head=n_head, d_k=d_k, d_v=d_v,
                               d_model=D, d_pad=Dp, ln_eps=ln_eps)

    def full_spec(arr):
        ndim = arr.ndim
        return pl.BlockSpec(arr.shape, lambda b, _nd=ndim: (0,) * _nd)

    in_specs = [
        pl.BlockSpec((1, Ld, Dp), lambda b: (b, 0, 0)),   # doc
        pl.BlockSpec((1, Nr, Dp), lambda b: (b, 0, 0)),   # rel
        full_spec(w_doc), full_spec(w_rel), full_spec(wfd), full_spec(wfr),
        full_spec(gd), full_spec(bd), full_spec(gr), full_spec(br),
    ]
    out_specs = [
        pl.BlockSpec((1, Ld, Dp), lambda b: (b, 0, 0)),
        pl.BlockSpec((1, Nr, Dp), lambda b: (b, 0, 0)),
    ]
    out_shape = [
        jax.ShapeDtypeStruct((B, Ld, Dp), bf16),
        jax.ShapeDtypeStruct((B, Nr, Dp), bf16),
    ]

    # ---- explicit VMEM budget (clamped so it is safe on v5e/v6e/v7x) --------
    p_doc = w_doc.shape[1]
    p_rel = w_rel.shape[1]
    hdv = n_head * d_v
    est = (
        2 * (Ld + Nr) * Dp * 2                              # inputs (2 bufs, bf16)
        + 2 * (Dp * (p_doc + p_rel) + 2 * hdv * Dp) * 2     # weights (2 bufs, bf16)
        + 2 * 4 * Dp * 4                                    # LN params (2 bufs, f32)
        + 2 * (Ld + Nr) * Dp * 2                            # outputs (2 bufs, bf16)
        + (Ld * p_doc + Nr * p_rel) * 4                     # projection temps (f32)
        + (Ld * Ld + Nr * Ld) * 4 * n_head                  # scores (unrolled heads)
        + 2 * (Ld + Nr) * hdv * 4                           # psi tensors (f32)
        + 2 * (Ld + Nr) * Dp * 4                            # pre-LN f32 temporaries
    )
    vmem_limit = int(min(max(2 * est, 32 * 1024 * 1024), 64 * 1024 * 1024))

    doc_out, rel_out = pl.pallas_call(
        kernel,
        out_shape=out_shape,
        grid_spec=pltpu.PrefetchScalarGridSpec(
            num_scalar_prefetch=0,
            grid=(B,),
            in_specs=in_specs,
            out_specs=out_specs,
        ),
        compiler_params=pltpu.CompilerParams(
            dimension_semantics=("parallel",),
            vmem_limit_bytes=vmem_limit),
    )(doc_p, rel_p, w_doc, w_rel, wfd, wfr, gd, bd, gr, br)

    # Slice off the lane padding; return in the input dtype.
    return (doc_out[..., :D].astype(doc_input.dtype),
            rel_out[..., :D].astype(rel_input.dtype))


def _reference(doc_input, rel_input, params, *, n_head, d_k, d_v,
               smoothing_factor=1e-6, ln_eps=1e-6):
    """Pure-JAX (f32) reference mirroring the torch forward (eval, mask=None)."""
    B, Ld, D = doc_input.shape
    _, Nr, _ = rel_input.shape

    def split_heads(x, d):
        return x.reshape(B, -1, n_head, d).transpose(0, 2, 1, 3)  # (B,H,L,d)

    q = split_heads(doc_input @ params["wq"], d_k)
    kd = split_heads(doc_input @ params["wkd"], d_k)
    vd = split_heads(doc_input @ params["wvd"], d_v)
    kr = split_heads(rel_input @ params["wkr"], d_k)
    vr = split_heads(rel_input @ params["wvr"], d_v)

    scale = 1.0 / math.sqrt(d_k)
    fused_k = kd + jnp.sum(kr, axis=2, keepdims=True)
    s_dd = jnp.einsum("bhqd,bhkd->bhqk", q, fused_k) * scale + smoothing_factor
    a_dd = jax.nn.softmax(s_dd, axis=-1)

    s_rd = jnp.einsum("bhrd,bhkd->bhrk", kr, kd) * scale + smoothing_factor
    a_rd = jax.nn.softmax(s_rd, axis=-1)
    psi_r = jnp.einsum("bhrk,bhkd->bhrd", a_rd, vd) + vr
    psi_r = psi_r.transpose(0, 2, 1, 3).reshape(B, Nr, -1)

    fused_v = vd + jnp.sum(vr, axis=2, keepdims=True)
    psi_i = jnp.einsum("bhqk,bhkd->bhqd", a_dd, fused_v)
    psi_i = psi_i.transpose(0, 2, 1, 3).reshape(B, Ld, -1)

    def layer_norm(x, gamma, beta):
        mu = jnp.mean(x, axis=-1, keepdims=True)
        var = jnp.mean((x - mu) ** 2, axis=-1, keepdims=True)
        return (x - mu) * jax.lax.rsqrt(var + ln_eps) * gamma + beta

    doc_out = layer_norm(psi_i @ params["wfd"] + doc_input,
                         params["gd"][0], params["bd"][0])
    rel_out = layer_norm(psi_r @ params["wfr"] + rel_input,
                         params["gr"][0], params["br"][0])
    return doc_out, rel_out


if __name__ == "__main__":
    B, Ld, Nr = 2, 8, 4
    d_model, n_head, d_k, d_v = 32, 4, 8, 8

    key = jax.random.PRNGKey(0)
    ks = jax.random.split(key, 9)

    def init_w(k, shape):
        return jax.random.normal(k, shape, dtype=jnp.float32) * 0.1

    params = {
        # Linear weights stored as (in_features, out_features) = torch W.T
        "wq":  init_w(ks[0], (d_model, n_head * d_k)),
        "wkd": init_w(ks[1], (d_model, n_head * d_k)),
        "wvd": init_w(ks[2], (d_model, n_head * d_v)),
        "wkr": init_w(ks[3], (d_model, n_head * d_k)),
        "wvr": init_w(ks[4], (d_model, n_head * d_v)),
        "wfd": init_w(ks[5], (n_head * d_v, d_model)),
        "wfr": init_w(ks[6], (n_head * d_v, d_model)),
        # LayerNorm params (torch default init: weight=1, bias=0)
        "gd": jnp.ones((1, d_model), jnp.float32),
        "bd": jnp.zeros((1, d_model), jnp.float32),
        "gr": jnp.ones((1, d_model), jnp.float32),
        "br": jnp.zeros((1, d_model), jnp.float32),
    }

    doc_input = jax.random.normal(ks[7], (B, Ld, d_model), dtype=jnp.float32)
    rel_input = jax.random.normal(ks[8], (B, Nr, d_model), dtype=jnp.float32)

    doc_out, rel_out = document_relation_attention(
        doc_input, rel_input, params, n_head=n_head, d_k=d_k, d_v=d_v)
    jax.block_until_ready((doc_out, rel_out))

    ref_doc, ref_rel = _reference(doc_input, rel_input, params,
                                  n_head=n_head, d_k=d_k, d_v=d_v)
    # bf16 inputs/weights/outputs (f32 accumulation) -> compare against the f32
    # reference with a bf16-appropriate tolerance.
    assert jnp.allclose(doc_out, ref_doc, atol=5e-2, rtol=5e-2)
    assert jnp.allclose(rel_out, ref_rel, atol=5e-2, rtol=5e-2)

    print("KERNEL_OK")
</pallas_src>

<mosaic_0001>
module attributes {stable_mosaic.version = 11 : i64} {
  func.func @_dra_kernel(%arg0: i32, %arg1: memref<1x8x128xbf16, #tpu.memory_space<vmem>>, %arg2: memref<1x4x128xbf16, #tpu.memory_space<vmem>>, %arg3: memref<128x96xbf16, #tpu.memory_space<vmem>>, %arg4: memref<128x64xbf16, #tpu.memory_space<vmem>>, %arg5: memref<32x128xbf16, #tpu.memory_space<vmem>>, %arg6: memref<32x128xbf16, #tpu.memory_space<vmem>>, %arg7: memref<1x128xf32, #tpu.memory_space<vmem>>, %arg8: memref<1x128xf32, #tpu.memory_space<vmem>>, %arg9: memref<1x128xf32, #tpu.memory_space<vmem>>, %arg10: memref<1x128xf32, #tpu.memory_space<vmem>>, %arg11: memref<1x8x128xbf16, #tpu.memory_space<vmem>>, %arg12: memref<1x4x128xbf16, #tpu.memory_space<vmem>>) attributes {dimension_semantics = [#tpu.dimension_semantics<parallel>], iteration_bounds = array<i64: 2>, scalar_prefetch = 0 : i64, scratch_operands = 0 : i64, tpu.core_type = #tpu.core_type<tc>, window_params = [{transform_indices = @transform_0, window_bounds = array<i64: 1, 8, 128>}, {transform_indices = @transform_1, window_bounds = array<i64: 1, 4, 128>}, {pipeline_mode = #tpu.pipeline_mode<synchronous>, transform_indices = @transform_2, window_bounds = array<i64: 128, 96>}, {pipeline_mode = #tpu.pipeline_mode<synchronous>, transform_indices = @transform_3, window_bounds = array<i64: 128, 64>}, {pipeline_mode = #tpu.pipeline_mode<synchronous>, transform_indices = @transform_4, window_bounds = array<i64: 32, 128>}, {pipeline_mode = #tpu.pipeline_mode<synchronous>, transform_indices = @transform_5, window_bounds = array<i64: 32, 128>}, {pipeline_mode = #tpu.pipeline_mode<synchronous>, transform_indices = @transform_6, window_bounds = array<i64: 1, 128>}, {pipeline_mode = #tpu.pipeline_mode<synchronous>, transform_indices = @transform_7, window_bounds = array<i64: 1, 128>}, {pipeline_mode = #tpu.pipeline_mode<synchronous>, transform_indices = @transform_8, window_bounds = array<i64: 1, 128>}, {pipeline_mode = #tpu.pipeline_mode<synchronous>, transform_indices = @transform_9, window_bounds = array<i64: 1, 128>}, {transform_indices = @transform_10, window_bounds = array<i64: 1, 8, 128>}, {transform_indices = @transform_11, window_bounds = array<i64: 1, 4, 128>}]} {
    %c0 = arith.constant 0 : index
    %c0_0 = arith.constant 0 : index
    %c0_1 = arith.constant 0 : index
    %0 = vector.load %arg1[%c0, %c0_0, %c0_1] : memref<1x8x128xbf16, #tpu.memory_space<vmem>>, vector<1x8x128xbf16>
    %1 = vector.shape_cast %0 : vector<1x8x128xbf16> to vector<8x128xbf16>
    %c0_2 = arith.constant 0 : index
    %c0_3 = arith.constant 0 : index
    %c0_4 = arith.constant 0 : index
    %2 = vector.load %arg2[%c0_2, %c0_3, %c0_4] : memref<1x4x128xbf16, #tpu.memory_space<vmem>>, vector<1x4x128xbf16>
    %3 = vector.shape_cast %2 : vector<1x4x128xbf16> to vector<4x128xbf16>
    %c0_5 = arith.constant 0 : index
    %c0_6 = arith.constant 0 : index
    %4 = vector.load %arg3[%c0_5, %c0_6] : memref<128x96xbf16, #tpu.memory_space<vmem>>, vector<128x96xbf16>
    %cst = arith.constant dense<0.000000e+00> : vector<8x96xf32>
    %5 = tpu.matmul %1, %4, %cst {dimension_numbers = #tpu.dot_dimension_numbers<[1], [0], [0], [1], [0, 0, 1, 1], [], []>} : vector<8x128xbf16>, vector<128x96xbf16>, vector<8x96xf32> -> vector<8x96xf32>
    %c0_7 = arith.constant 0 : index
    %c0_8 = arith.constant 0 : index
    %6 = vector.load %arg4[%c0_7, %c0_8] : memref<128x64xbf16, #tpu.memory_space<vmem>>, vector<128x64xbf16>
    %cst_9 = arith.constant dense<0.000000e+00> : vector<4x64xf32>
    %7 = tpu.matmul %3, %6, %cst_9 {dimension_numbers = #tpu.dot_dimension_numbers<[1], [0], [0], [1], [0, 0, 1, 1], [], []>} : vector<4x128xbf16>, vector<128x64xbf16>, vector<4x64xf32> -> vector<4x64xf32>
    %8 = vector.extract_strided_slice %5 {offsets = [0, 0], sizes = [8, 32], strides = [1, 1]} : vector<8x96xf32> to vector<8x32xf32>
    %9 = vector.extract_strided_slice %5 {offsets = [0, 32], sizes = [8, 32], strides = [1, 1]} : vector<8x96xf32> to vector<8x32xf32>
    %10 = vector.extract_strided_slice %5 {offsets = [0, 64], sizes = [8, 32], strides = [1, 1]} : vector<8x96xf32> to vector<8x32xf32>
    %11 = vector.extract_strided_slice %7 {offsets = [0, 0], sizes = [4, 32], strides = [1, 1]} : vector<4x64xf32> to vector<4x32xf32>
    %12 = vector.extract_strided_slice %7 {offsets = [0, 32], sizes = [4, 32], strides = [1, 1]} : vector<4x64xf32> to vector<4x32xf32>
    %13 = vector.extract_strided_slice %8 {offsets = [0, 0], sizes = [8, 8], strides = [1, 1]} : vector<8x32xf32> to vector<8x8xf32>
    %14 = vector.extract_strided_slice %9 {offsets = [0, 0], sizes = [8, 8], strides = [1, 1]} : vector<8x32xf32> to vector<8x8xf32>
    %15 = vector.extract_strided_slice %10 {offsets = [0, 0], sizes = [8, 8], strides = [1, 1]} : vector<8x32xf32> to vector<8x8xf32>
    %16 = vector.extract_strided_slice %11 {offsets = [0, 0], sizes = [4, 8], strides = [1, 1]} : vector<4x32xf32> to vector<4x8xf32>
    %17 = vector.extract_strided_slice %12 {offsets = [0, 0], sizes = [4, 8], strides = [1, 1]} : vector<4x32xf32> to vector<4x8xf32>
    %cst_10 = arith.constant dense<0.000000e+00> : vector<8xf32>
    %18 = vector.multi_reduction <add>, %16, %cst_10 [0] : vector<4x8xf32> to vector<8xf32>
    %19 = vector.shape_cast %18 : vector<8xf32> to vector<1x8xf32>
    %20 = vector.broadcast %19 : vector<1x8xf32> to vector<8x8xf32>
    %21 = arith.addf %14, %20 : vector<8x8xf32>
    %cst_11 = arith.constant dense<0.000000e+00> : vector<8xf32>
    %22 = vector.multi_reduction <add>, %17, %cst_11 [0] : vector<4x8xf32> to vector<8xf32>
    %23 = vector.shape_cast %22 : vector<8xf32> to vector<1x8xf32>
    %24 = vector.broadcast %23 : vector<1x8xf32> to vector<8x8xf32>
    %25 = arith.addf %15, %24 : vector<8x8xf32>
    %26 = arith.truncf %13 : vector<8x8xf32> to vector<8x8xbf16>
    %27 = arith.truncf %21 : vector<8x8xf32> to vector<8x8xbf16>
    %cst_12 = arith.constant dense<0.000000e+00> : vector<8x8xf32>
    %28 = tpu.matmul %26, %27, %cst_12 {dimension_numbers = #tpu.dot_dimension_numbers<[1], [1], [0], [0], [0, 0, 1, 0], [], []>} : vector<8x8xbf16>, vector<8x8xbf16>, vector<8x8xf32> -> vector<8x8xf32>
    %cst_13 = arith.constant dense<0xFF800000> : vector<8xf32>
    %29 = vector.multi_reduction <maximumf>, %28, %cst_13 [1] : vector<8x8xf32> to vector<8xf32>
    %30 = vector.shape_cast %29 : vector<8xf32> to vector<8x1xf32>
    %31 = vector.broadcast %30 : vector<8x1xf32> to vector<8x8xf32>
    %32 = arith.subf %28, %31 : vector<8x8xf32>
    %33 = math.exp %32 : vector<8x8xf32>
    %cst_14 = arith.constant dense<0.000000e+00> : vector<8xf32>
    %34 = vector.multi_reduction <add>, %33, %cst_14 [1] : vector<8x8xf32> to vector<8xf32>
    %35 = vector.shape_cast %34 : vector<8xf32> to vector<8x1xf32>
    %36 = tpu.reciprocal %35 : vector<8x1xf32> -> vector<8x1xf32>
    %37 = vector.broadcast %36 : vector<8x1xf32> to vector<8x8xf32>
    %38 = arith.mulf %33, %37 : vector<8x8xf32>
    %39 = arith.truncf %38 : vector<8x8xf32> to vector<8x8xbf16>
    %40 = arith.truncf %25 : vector<8x8xf32> to vector<8x8xbf16>
    %cst_15 = arith.constant dense<0.000000e+00> : vector<8x8xf32>
    %41 = tpu.matmul %39, %40, %cst_15 {dimension_numbers = #tpu.dot_dimension_numbers<[1], [0], [0], [1], [0, 0, 1, 1], [], []>} : vector<8x8xbf16>, vector<8x8xbf16>, vector<8x8xf32> -> vector<8x8xf32>
    %cst_16 = arith.constant 0.353553385 : f32
    %42 = vector.broadcast %cst_16 : f32 to vector<4x8xf32>
    %43 = arith.mulf %16, %42 : vector<4x8xf32>
    %44 = arith.truncf %43 : vector<4x8xf32> to vector<4x8xbf16>
    %45 = arith.truncf %14 : vector<8x8xf32> to vector<8x8xbf16>
    %cst_17 = arith.constant dense<0.000000e+00> : vector<4x8xf32>
    %46 = tpu.matmul %44, %45, %cst_17 {dimension_numbers = #tpu.dot_dimension_numbers<[1], [1], [0], [0], [0, 0, 1, 0], [], []>} : vector<4x8xbf16>, vector<8x8xbf16>, vector<4x8xf32> -> vector<4x8xf32>
    %cst_18 = arith.constant dense<0xFF800000> : vector<4xf32>
    %47 = vector.multi_reduction <maximumf>, %46, %cst_18 [1] : vector<4x8xf32> to vector<4xf32>
    %48 = vector.shape_cast %47 : vector<4xf32> to vector<4x1xf32>
    %49 = vector.broadcast %48 : vector<4x1xf32> to vector<4x8xf32>
    %50 = arith.subf %46, %49 : vector<4x8xf32>
    %51 = math.exp %50 : vector<4x8xf32>
    %cst_19 = arith.constant dense<0.000000e+00> : vector<4xf32>
    %52 = vector.multi_reduction <add>, %51, %cst_19 [1] : vector<4x8xf32> to vector<4xf32>
    %53 = vector.shape_cast %52 : vector<4xf32> to vector<4x1xf32>
    %54 = tpu.reciprocal %53 : vector<4x1xf32> -> vector<4x1xf32>
    %55 = vector.broadcast %54 : vector<4x1xf32> to vector<4x8xf32>
    %56 = arith.mulf %51, %55 : vector<4x8xf32>
    %57 = arith.truncf %56 : vector<4x8xf32> to vector<4x8xbf16>
    %58 = arith.truncf %15 : vector<8x8xf32> to vector<8x8xbf16>
    %cst_20 = arith.constant dense<0.000000e+00> : vector<4x8xf32>
    %59 = tpu.matmul %57, %58, %cst_20 {dimension_numbers = #tpu.dot_dimension_numbers<[1], [0], [0], [1], [0, 0, 1, 1], [], []>} : vector<4x8xbf16>, vector<8x8xbf16>, vector<4x8xf32> -> vector<4x8xf32>
    %60 = arith.addf %59, %17 : vector<4x8xf32>
    %61 = vector.extract_strided_slice %8 {offsets = [0, 8], sizes = [8, 8], strides = [1, 1]} : vector<8x32xf32> to vector<8x8xf32>
    %62 = vector.extract_strided_slice %9 {offsets = [0, 8], sizes = [8, 8], strides = [1, 1]} : vector<8x32xf32> to vector<8x8xf32>
    %63 = vector.extract_strided_slice %10 {offsets = [0, 8], sizes = [8, 8], strides = [1, 1]} : vector<8x32xf32> to vector<8x8xf32>
    %64 = vector.extract_strided_slice %11 {offsets = [0, 8], sizes = [4, 8], strides = [1, 1]} : vector<4x32xf32> to vector<4x8xf32>
    %65 = vector.extract_strided_slice %12 {offsets = [0, 8], sizes = [4, 8], strides = [1, 1]} : vector<4x32xf32> to vector<4x8xf32>
    %cst_21 = arith.constant dense<0.000000e+00> : vector<8xf32>
    %66 = vector.multi_reduction <add>, %64, %cst_21 [0] : vector<4x8xf32> to vector<8xf32>
    %67 = vector.shape_cast %66 : vector<8xf32> to vector<1x8xf32>
    %68 = vector.broadcast %67 : vector<1x8xf32> to vector<8x8xf32>
    %69 = arith.addf %62, %68 : vector<8x8xf32>
    %cst_22 = arith.constant dense<0.000000e+00> : vector<8xf32>
    %70 = vector.multi_reduction <add>, %65, %cst_22 [0] : vector<4x8xf32> to vector<8xf32>
    %71 = vector.shape_cast %70 : vector<8xf32> to vector<1x8xf32>
    %72 = vector.broadcast %71 : vector<1x8xf32> to vector<8x8xf32>
    %73 = arith.addf %63, %72 : vector<8x8xf32>
    %74 = arith.truncf %61 : vector<8x8xf32> to vector<8x8xbf16>
    %75 = arith.truncf %69 : vector<8x8xf32> to vector<8x8xbf16>
    %cst_23 = arith.constant dense<0.000000e+00> : vector<8x8xf32>
    %76 = tpu.matmul %74, %75, %cst_23 {dimension_numbers = #tpu.dot_dimension_numbers<[1], [1], [0], [0], [0, 0, 1, 0], [], []>} : vector<8x8xbf16>, vector<8x8xbf16>, vector<8x8xf32> -> vector<8x8xf32>
    %cst_24 = arith.constant dense<0xFF800000> : vector<8xf32>
    %77 = vector.multi_reduction <maximumf>, %76, %cst_24 [1] : vector<8x8xf32> to vector<8xf32>
    %78 = vector.shape_cast %77 : vector<8xf32> to vector<8x1xf32>
    %79 = vector.broadcast %78 : vector<8x1xf32> to vector<8x8xf32>
    %80 = arith.subf %76, %79 : vector<8x8xf32>
    %81 = math.exp %80 : vector<8x8xf32>
    %cst_25 = arith.constant dense<0.000000e+00> : vector<8xf32>
    %82 = vector.multi_reduction <add>, %81, %cst_25 [1] : vector<8x8xf32> to vector<8xf32>
    %83 = vector.shape_cast %82 : vector<8xf32> to vector<8x1xf32>
    %84 = tpu.reciprocal %83 : vector<8x1xf32> -> vector<8x1xf32>
    %85 = vector.broadcast %84 : vector<8x1xf32> to vector<8x8xf32>
    %86 = arith.mulf %81, %85 : vector<8x8xf32>
    %87 = arith.truncf %86 : vector<8x8xf32> to vector<8x8xbf16>
    %88 = arith.truncf %73 : vector<8x8xf32> to vector<8x8xbf16>
    %cst_26 = arith.constant dense<0.000000e+00> : vector<8x8xf32>
    %89 = tpu.matmul %87, %88, %cst_26 {dimension_numbers = #tpu.dot_dimension_numbers<[1], [0], [0], [1], [0, 0, 1, 1], [], []>} : vector<8x8xbf16>, vector<8x8xbf16>, vector<8x8xf32> -> vector<8x8xf32>
    %cst_27 = arith.constant 0.353553385 : f32
    %90 = vector.broadcast %cst_27 : f32 to vector<4x8xf32>
    %91 = arith.mulf %64, %90 : vector<4x8xf32>
    %92 = arith.truncf %91 : vector<4x8xf32> to vector<4x8xbf16>
    %93 = arith.truncf %62 : vector<8x8xf32> to vector<8x8xbf16>
    %cst_28 = arith.constant dense<0.000000e+00> : vector<4x8xf32>
    %94 = tpu.matmul %92, %93, %cst_28 {dimension_numbers = #tpu.dot_dimension_numbers<[1], [1], [0], [0], [0, 0, 1, 0], [], []>} : vector<4x8xbf16>, vector<8x8xbf16>, vector<4x8xf32> -> vector<4x8xf32>
    %cst_29 = arith.constant dense<0xFF800000> : vector<4xf32>
    %95 = vector.multi_reduction <maximumf>, %94, %cst_29 [1] : vector<4x8xf32> to vector<4xf32>
    %96 = vector.shape_cast %95 : vector<4xf32> to vector<4x1xf32>
    %97 = vector.broadcast %96 : vector<4x1xf32> to vector<4x8xf32>
    %98 = arith.subf %94, %97 : vector<4x8xf32>
    %99 = math.exp %98 : vector<4x8xf32>
    %cst_30 = arith.constant dense<0.000000e+00> : vector<4xf32>
    %100 = vector.multi_reduction <add>, %99, %cst_30 [1] : vector<4x8xf32> to vector<4xf32>
    %101 = vector.shape_cast %100 : vector<4xf32> to vector<4x1xf32>
    %102 = tpu.reciprocal %101 : vector<4x1xf32> -> vector<4x1xf32>
    %103 = vector.broadcast %102 : vector<4x1xf32> to vector<4x8xf32>
    %104 = arith.mulf %99, %103 : vector<4x8xf32>
    %105 = arith.truncf %104 : vector<4x8xf32> to vector<4x8xbf16>
    %106 = arith.truncf %63 : vector<8x8xf32> to vector<8x8xbf16>
    %cst_31 = arith.constant dense<0.000000e+00> : vector<4x8xf32>
    %107 = tpu.matmul %105, %106, %cst_31 {dimension_numbers = #tpu.dot_dimension_numbers<[1], [0], [0], [1], [0, 0, 1, 1], [], []>} : vector<4x8xbf16>, vector<8x8xbf16>, vector<4x8xf32> -> vector<4x8xf32>
    %108 = arith.addf %107, %65 : vector<4x8xf32>
    %109 = vector.extract_strided_slice %8 {offsets = [0, 16], sizes = [8, 8], strides = [1, 1]} : vector<8x32xf32> to vector<8x8xf32>
    %110 = vector.extract_strided_slice %9 {offsets = [0, 16], sizes = [8, 8], strides = [1, 1]} : vector<8x32xf32> to vector<8x8xf32>
    %111 = vector.extract_strided_slice %10 {offsets = [0, 16], sizes = [8, 8], strides = [1, 1]} : vector<8x32xf32> to vector<8x8xf32>
    %112 = vector.extract_strided_slice %11 {offsets = [0, 16], sizes = [4, 8], strides = [1, 1]} : vector<4x32xf32> to vector<4x8xf32>
    %113 = vector.extract_strided_slice %12 {offsets = [0, 16], sizes = [4, 8], strides = [1, 1]} : vector<4x32xf32> to vector<4x8xf32>
    %cst_32 = arith.constant dense<0.000000e+00> : vector<8xf32>
    %114 = vector.multi_reduction <add>, %112, %cst_32 [0] : vector<4x8xf32> to vector<8xf32>
    %115 = vector.shape_cast %114 : vector<8xf32> to vector<1x8xf32>
    %116 = vector.broadcast %115 : vector<1x8xf32> to vector<8x8xf32>
    %117 = arith.addf %110, %116 : vector<8x8xf32>
    %cst_33 = arith.constant dense<0.000000e+00> : vector<8xf32>
    %118 = vector.multi_reduction <add>, %113, %cst_33 [0] : vector<4x8xf32> to vector<8xf32>
    %119 = vector.shape_cast %118 : vector<8xf32> to vector<1x8xf32>
    %120 = vector.broadcast %119 : vector<1x8xf32> to vector<8x8xf32>
    %121 = arith.addf %111, %120 : vector<8x8xf32>
    %122 = arith.truncf %109 : vector<8x8xf32> to vector<8x8xbf16>
    %123 = arith.truncf %117 : vector<8x8xf32> to vector<8x8xbf16>
    %cst_34 = arith.constant dense<0.000000e+00> : vector<8x8xf32>
    %124 = tpu.matmul %122, %123, %cst_34 {dimension_numbers = #tpu.dot_dimension_numbers<[1], [1], [0], [0], [0, 0, 1, 0], [], []>} : vector<8x8xbf16>, vector<8x8xbf16>, vector<8x8xf32> -> vector<8x8xf32>
    %cst_35 = arith.constant dense<0xFF800000> : vector<8xf32>
    %125 = vector.multi_reduction <maximumf>, %124, %cst_35 [1] : vector<8x8xf32> to vector<8xf32>
    %126 = vector.shape_cast %125 : vector<8xf32> to vector<8x1xf32>
    %127 = vector.broadcast %126 : vector<8x1xf32> to vector<8x8xf32>
    %128 = arith.subf %124, %127 : vector<8x8xf32>
    %129 = math.exp %128 : vector<8x8xf32>
    %cst_36 = arith.constant dense<0.000000e+00> : vector<8xf32>
    %130 = vector.multi_reduction <add>, %129, %cst_36 [1] : vector<8x8xf32> to vector<8xf32>
    %131 = vector.shape_cast %130 : vector<8xf32> to vector<8x1xf32>
    %132 = tpu.reciprocal %131 : vector<8x1xf32> -> vector<8x1xf32>
    %133 = vector.broadcast %132 : vector<8x1xf32> to vector<8x8xf32>
    %134 = arith.mulf %129, %133 : vector<8x8xf32>
    %135 = arith.truncf %134 : vector<8x8xf32> to vector<8x8xbf16>
    %136 = arith.truncf %121 : vector<8x8xf32> to vector<8x8xbf16>
    %cst_37 = arith.constant dense<0.000000e+00> : vector<8x8xf32>
    %137 = tpu.matmul %135, %136, %cst_37 {dimension_numbers = #tpu.dot_dimension_numbers<[1], [0], [0], [1], [0, 0, 1, 1], [], []>} : vector<8x8xbf16>, vector<8x8xbf16>, vector<8x8xf32> -> vector<8x8xf32>
    %cst_38 = arith.constant 0.353553385 : f32
    %138 = vector.broadcast %cst_38 : f32 to vector<4x8xf32>
    %139 = arith.mulf %112, %138 : vector<4x8xf32>
    %140 = arith.truncf %139 : vector<4x8xf32> to vector<4x8xbf16>
    %141 = arith.truncf %110 : vector<8x8xf32> to vector<8x8xbf16>
    %cst_39 = arith.constant dense<0.000000e+00> : vector<4x8xf32>
    %142 = tpu.matmul %140, %141, %cst_39 {dimension_numbers = #tpu.dot_dimension_numbers<[1], [1], [0], [0], [0, 0, 1, 0], [], []>} : vector<4x8xbf16>, vector<8x8xbf16>, vector<4x8xf32> -> vector<4x8xf32>
    %cst_40 = arith.constant dense<0xFF800000> : vector<4xf32>
    %143 = vector.multi_reduction <maximumf>, %142, %cst_40 [1] : vector<4x8xf32> to vector<4xf32>
    %144 = vector.shape_cast %143 : vector<4xf32> to vector<4x1xf32>
    %145 = vector.broadcast %144 : vector<4x1xf32> to vector<4x8xf32>
    %146 = arith.subf %142, %145 : vector<4x8xf32>
    %147 = math.exp %146 : vector<4x8xf32>
    %cst_41 = arith.constant dense<0.000000e+00> : vector<4xf32>
    %148 = vector.multi_reduction <add>, %147, %cst_41 [1] : vector<4x8xf32> to vector<4xf32>
    %149 = vector.shape_cast %148 : vector<4xf32> to vector<4x1xf32>
    %150 = tpu.reciprocal %149 : vector<4x1xf32> -> vector<4x1xf32>
    %151 = vector.broadcast %150 : vector<4x1xf32> to vector<4x8xf32>
    %152 = arith.mulf %147, %151 : vector<4x8xf32>
    %153 = arith.truncf %152 : vector<4x8xf32> to vector<4x8xbf16>
    %154 = arith.truncf %111 : vector<8x8xf32> to vector<8x8xbf16>
    %cst_42 = arith.constant dense<0.000000e+00> : vector<4x8xf32>
    %155 = tpu.matmul %153, %154, %cst_42 {dimension_numbers = #tpu.dot_dimension_numbers<[1], [0], [0], [1], [0, 0, 1, 1], [], []>} : vector<4x8xbf16>, vector<8x8xbf16>, vector<4x8xf32> -> vector<4x8xf32>
    %156 = arith.addf %155, %113 : vector<4x8xf32>
    %157 = vector.extract_strided_slice %8 {offsets = [0, 24], sizes = [8, 8], strides = [1, 1]} : vector<8x32xf32> to vector<8x8xf32>
    %158 = vector.extract_strided_slice %9 {offsets = [0, 24], sizes = [8, 8], strides = [1, 1]} : vector<8x32xf32> to vector<8x8xf32>
    %159 = vector.extract_strided_slice %10 {offsets = [0, 24], sizes = [8, 8], strides = [1, 1]} : vector<8x32xf32> to vector<8x8xf32>
    %160 = vector.extract_strided_slice %11 {offsets = [0, 24], sizes = [4, 8], strides = [1, 1]} : vector<4x32xf32> to vector<4x8xf32>
    %161 = vector.extract_strided_slice %12 {offsets = [0, 24], sizes = [4, 8], strides = [1, 1]} : vector<4x32xf32> to vector<4x8xf32>
    %cst_43 = arith.constant dense<0.000000e+00> : vector<8xf32>
    %162 = vector.multi_reduction <add>, %160, %cst_43 [0] : vector<4x8xf32> to vector<8xf32>
    %163 = vector.shape_cast %162 : vector<8xf32> to vector<1x8xf32>
    %164 = vector.broadcast %163 : vector<1x8xf32> to vector<8x8xf32>
    %165 = arith.addf %158, %164 : vector<8x8xf32>
    %cst_44 = arith.constant dense<0.000000e+00> : vector<8xf32>
    %166 = vector.multi_reduction <add>, %161, %cst_44 [0] : vector<4x8xf32> to vector<8xf32>
    %167 = vector.shape_cast %166 : vector<8xf32> to vector<1x8xf32>
    %168 = vector.broadcast %167 : vector<1x8xf32> to vector<8x8xf32>
    %169 = arith.addf %159, %168 : vector<8x8xf32>
    %170 = arith.truncf %157 : vector<8x8xf32> to vector<8x8xbf16>
    %171 = arith.truncf %165 : vector<8x8xf32> to vector<8x8xbf16>
    %cst_45 = arith.constant dense<0.000000e+00> : vector<8x8xf32>
    %172 = tpu.matmul %170, %171, %cst_45 {dimension_numbers = #tpu.dot_dimension_numbers<[1], [1], [0], [0], [0, 0, 1, 0], [], []>} : vector<8x8xbf16>, vector<8x8xbf16>, vector<8x8xf32> -> vector<8x8xf32>
    %cst_46 = arith.constant dense<0xFF800000> : vector<8xf32>
    %173 = vector.multi_reduction <maximumf>, %172, %cst_46 [1] : vector<8x8xf32> to vector<8xf32>
    %174 = vector.shape_cast %173 : vector<8xf32> to vector<8x1xf32>
    %175 = vector.broadcast %174 : vector<8x1xf32> to vector<8x8xf32>
    %176 = arith.subf %172, %175 : vector<8x8xf32>
    %177 = math.exp %176 : vector<8x8xf32>
    %cst_47 = arith.constant dense<0.000000e+00> : vector<8xf32>
    %178 = vector.multi_reduction <add>, %177, %cst_47 [1] : vector<8x8xf32> to vector<8xf32>
    %179 = vector.shape_cast %178 : vector<8xf32> to vector<8x1xf32>
    %180 = tpu.reciprocal %179 : vector<8x1xf32> -> vector<8x1xf32>
    %181 = vector.broadcast %180 : vector<8x1xf32> to vector<8x8xf32>
    %182 = arith.mulf %177, %181 : vector<8x8xf32>
    %183 = arith.truncf %182 : vector<8x8xf32> to vector<8x8xbf16>
    %184 = arith.truncf %169 : vector<8x8xf32> to vector<8x8xbf16>
    %cst_48 = arith.constant dense<0.000000e+00> : vector<8x8xf32>
    %185 = tpu.matmul %183, %184, %cst_48 {dimension_numbers = #tpu.dot_dimension_numbers<[1], [0], [0], [1], [0, 0, 1, 1], [], []>} : vector<8x8xbf16>, vector<8x8xbf16>, vector<8x8xf32> -> vector<8x8xf32>
    %cst_49 = arith.constant 0.353553385 : f32
    %186 = vector.broadcast %cst_49 : f32 to vector<4x8xf32>
    %187 = arith.mulf %160, %186 : vector<4x8xf32>
    %188 = arith.truncf %187 : vector<4x8xf32> to vector<4x8xbf16>
    %189 = arith.truncf %158 : vector<8x8xf32> to vector<8x8xbf16>
    %cst_50 = arith.constant dense<0.000000e+00> : vector<4x8xf32>
    %190 = tpu.matmul %188, %189, %cst_50 {dimension_numbers = #tpu.dot_dimension_numbers<[1], [1], [0], [0], [0, 0, 1, 0], [], []>} : vector<4x8xbf16>, vector<8x8xbf16>, vector<4x8xf32> -> vector<4x8xf32>
    %cst_51 = arith.constant dense<0xFF800000> : vector<4xf32>
    %191 = vector.multi_reduction <maximumf>, %190, %cst_51 [1] : vector<4x8xf32> to vector<4xf32>
    %192 = vector.shape_cast %191 : vector<4xf32> to vector<4x1xf32>
    %193 = vector.broadcast %192 : vector<4x1xf32> to vector<4x8xf32>
    %194 = arith.subf %190, %193 : vector<4x8xf32>
    %195 = math.exp %194 : vector<4x8xf32>
    %cst_52 = arith.constant dense<0.000000e+00> : vector<4xf32>
    %196 = vector.multi_reduction <add>, %195, %cst_52 [1] : vector<4x8xf32> to vector<4xf32>
    %197 = vector.shape_cast %196 : vector<4xf32> to vector<4x1xf32>
    %198 = tpu.reciprocal %197 : vector<4x1xf32> -> vector<4x1xf32>
    %199 = vector.broadcast %198 : vector<4x1xf32> to vector<4x8xf32>
    %200 = arith.mulf %195, %199 : vector<4x8xf32>
    %201 = arith.truncf %200 : vector<4x8xf32> to vector<4x8xbf16>
    %202 = arith.truncf %159 : vector<8x8xf32> to vector<8x8xbf16>
    %cst_53 = arith.constant dense<0.000000e+00> : vector<4x8xf32>
    %203 = tpu.matmul %201, %202, %cst_53 {dimension_numbers = #tpu.dot_dimension_numbers<[1], [0], [0], [1], [0, 0, 1, 1], [], []>} : vector<4x8xbf16>, vector<8x8xbf16>, vector<4x8xf32> -> vector<4x8xf32>
    %204 = arith.addf %203, %161 : vector<4x8xf32>
    %205 = tpu.concatenate %41, %89, %137, %185 in 1 : vector<8x8xf32>, vector<8x8xf32>, vector<8x8xf32>, vector<8x8xf32> -> vector<8x32xf32>
    %206 = tpu.concatenate %60, %108, %156, %204 in 1 : vector<4x8xf32>, vector<4x8xf32>, vector<4x8xf32>, vector<4x8xf32> -> vector<4x32xf32>
    %207 = arith.truncf %205 : vector<8x32xf32> to vector<8x32xbf16>
    %c0_54 = arith.constant 0 : index
    %c0_55 = arith.constant 0 : index
    %208 = vector.load %arg5[%c0_54, %c0_55] : memref<32x128xbf16, #tpu.memory_space<vmem>>, vector<32x128xbf16>
    %cst_56 = arith.constant dense<0.000000e+00> : vector<8x128xf32>
    %209 = tpu.matmul %207, %208, %cst_56 {dimension_numbers = #tpu.dot_dimension_numbers<[1], [0], [0], [1], [0, 0, 1, 1], [], []>} : vector<8x32xbf16>, vector<32x128xbf16>, vector<8x128xf32> -> vector<8x128xf32>
    %210 = arith.extf %1 : vector<8x128xbf16> to vector<8x128xf32>
    %211 = arith.addf %209, %210 : vector<8x128xf32>
    %212 = arith.truncf %206 : vector<4x32xf32> to vector<4x32xbf16>
    %c0_57 = arith.constant 0 : index
    %c0_58 = arith.constant 0 : index
    %213 = vector.load %arg6[%c0_57, %c0_58] : memref<32x128xbf16, #tpu.memory_space<vmem>>, vector<32x128xbf16>
    %cst_59 = arith.constant dense<0.000000e+00> : vector<4x128xf32>
    %214 = tpu.matmul %212, %213, %cst_59 {dimension_numbers = #tpu.dot_dimension_numbers<[1], [0], [0], [1], [0, 0, 1, 1], [], []>} : vector<4x32xbf16>, vector<32x128xbf16>, vector<4x128xf32> -> vector<4x128xf32>
    %215 = arith.extf %3 : vector<4x128xbf16> to vector<4x128xf32>
    %216 = arith.addf %214, %215 : vector<4x128xf32>
    %217 = tpu.iota {dimensions = array<i32: 1>} : vector<1x128xi32>
    %c32_i32 = arith.constant 32 : i32
    %218 = vector.broadcast %c32_i32 : i32 to vector<1x128xi32>
    %219 = arith.cmpi slt, %217, %218 : vector<1x128xi32>
    %220 = arith.extui %219 : vector<1x128xi1> to vector<1x128xi32>
    %221 = arith.sitofp %220 : vector<1x128xi32> to vector<1x128xf32>
    %c0_60 = arith.constant 0 : index
    %c0_61 = arith.constant 0 : index
    %222 = vector.load %arg7[%c0_60, %c0_61] : memref<1x128xf32, #tpu.memory_space<vmem>>, vector<1x128xf32>
    %c0_62 = arith.constant 0 : index
    %c0_63 = arith.constant 0 : index
    %223 = vector.load %arg8[%c0_62, %c0_63] : memref<1x128xf32, #tpu.memory_space<vmem>>, vector<1x128xf32>
    %cst_64 = arith.constant dense<0.000000e+00> : vector<8xf32>
    %224 = vector.multi_reduction <add>, %211, %cst_64 [1] : vector<8x128xf32> to vector<8xf32>
    %225 = vector.shape_cast %224 : vector<8xf32> to vector<8x1xf32>
    %cst_65 = arith.constant 3.125000e-02 : f32
    %226 = vector.broadcast %cst_65 : f32 to vector<8x1xf32>
    %227 = arith.mulf %225, %226 : vector<8x1xf32>
    %228 = vector.broadcast %227 : vector<8x1xf32> to vector<8x128xf32>
    %229 = arith.subf %211, %228 : vector<8x128xf32>
    %230 = vector.broadcast %221 : vector<1x128xf32> to vector<8x128xf32>
    %231 = arith.mulf %229, %230 : vector<8x128xf32>
    %232 = arith.mulf %231, %231 : vector<8x128xf32>
    %cst_66 = arith.constant dense<0.000000e+00> : vector<8xf32>
    %233 = vector.multi_reduction <add>, %232, %cst_66 [1] : vector<8x128xf32> to vector<8xf32>
    %234 = vector.shape_cast %233 : vector<8xf32> to vector<8x1xf32>
    %cst_67 = arith.constant 3.125000e-02 : f32
    %235 = vector.broadcast %cst_67 : f32 to vector<8x1xf32>
    %236 = arith.mulf %234, %235 : vector<8x1xf32>
    %cst_68 = arith.constant 9.99999997E-7 : f32
    %237 = vector.broadcast %cst_68 : f32 to vector<8x1xf32>
    %238 = arith.addf %236, %237 : vector<8x1xf32>
    %239 = math.rsqrt %238 : vector<8x1xf32>
    %240 = vector.broadcast %239 : vector<8x1xf32> to vector<8x128xf32>
    %241 = arith.mulf %231, %240 : vector<8x128xf32>
    %242 = vector.broadcast %222 : vector<1x128xf32> to vector<8x128xf32>
    %243 = arith.mulf %241, %242 : vector<8x128xf32>
    %244 = vector.broadcast %223 : vector<1x128xf32> to vector<8x128xf32>
    %245 = arith.addf %243, %244 : vector<8x128xf32>
    %246 = arith.truncf %245 : vector<8x128xf32> to vector<8x128xbf16>
    %c0_69 = arith.constant 0 : index
    %c0_70 = arith.constant 0 : index
    %c0_71 = arith.constant 0 : index
    %247 = vector.load %arg11[%c0_69, %c0_70, %c0_71] : memref<1x8x128xbf16, #tpu.memory_space<vmem>>, vector<1x8x128xbf16>
    %248 = vector.shape_cast %247 : vector<1x8x128xbf16> to vector<8x128xbf16>
    %249 = vector.shape_cast %246 : vector<8x128xbf16> to vector<1x8x128xbf16>
    tpu.vector_store %arg11[%c0_69, %c0_70, %c0_71], %249 {strides = array<i32>} : memref<1x8x128xbf16, #tpu.memory_space<vmem>>, vector<1x8x128xbf16>,
    %c0_72 = arith.constant 0 : index
    %c0_73 = arith.constant 0 : index
    %250 = vector.load %arg9[%c0_72, %c0_73] : memref<1x128xf32, #tpu.memory_space<vmem>>, vector<1x128xf32>
    %c0_74 = arith.constant 0 : index
    %c0_75 = arith.constant 0 : index
    %251 = vector.load %arg10[%c0_74, %c0_75] : memref<1x128xf32, #tpu.memory_space<vmem>>, vector<1x128xf32>
    %cst_76 = arith.constant dense<0.000000e+00> : vector<4xf32>
    %252 = vector.multi_reduction <add>, %216, %cst_76 [1] : vector<4x128xf32> to vector<4xf32>
    %253 = vector.shape_cast %252 : vector<4xf32> to vector<4x1xf32>
    %cst_77 = arith.constant 3.125000e-02 : f32
    %254 = vector.broadcast %cst_77 : f32 to vector<4x1xf32>
    %255 = arith.mulf %253, %254 : vector<4x1xf32>
    %256 = vector.broadcast %255 : vector<4x1xf32> to vector<4x128xf32>
    %257 = arith.subf %216, %256 : vector<4x128xf32>
    %258 = vector.broadcast %221 : vector<1x128xf32> to vector<4x128xf32>
    %259 = arith.mulf %257, %258 : vector<4x128xf32>
    %260 = arith.mulf %259, %259 : vector<4x128xf32>
    %cst_78 = arith.constant dense<0.000000e+00> : vector<4xf32>
    %261 = vector.multi_reduction <add>, %260, %cst_78 [1] : vector<4x128xf32> to vector<4xf32>
    %262 = vector.shape_cast %261 : vector<4xf32> to vector<4x1xf32>
    %cst_79 = arith.constant 3.125000e-02 : f32
    %263 = vector.broadcast %cst_79 : f32 to vector<4x1xf32>
    %264 = arith.mulf %262, %263 : vector<4x1xf32>
    %cst_80 = arith.constant 9.99999997E-7 : f32
    %265 = vector.broadcast %cst_80 : f32 to vector<4x1xf32>
    %266 = arith.addf %264, %265 : vector<4x1xf32>
    %267 = math.rsqrt %266 : vector<4x1xf32>
    %268 = vector.broadcast %267 : vector<4x1xf32> to vector<4x128xf32>
    %269 = arith.mulf %259, %268 : vector<4x128xf32>
    %270 = vector.broadcast %250 : vector<1x128xf32> to vector<4x128xf32>
    %271 = arith.mulf %269, %270 : vector<4x128xf32>
    %272 = vector.broadcast %251 : vector<1x128xf32> to vector<4x128xf32>
    %273 = arith.addf %271, %272 : vector<4x128xf32>
    %274 = arith.truncf %273 : vector<4x128xf32> to vector<4x128xbf16>
    %c0_81 = arith.constant 0 : index
    %c0_82 = arith.constant 0 : index
    %c0_83 = arith.constant 0 : index
    %275 = vector.load %arg12[%c0_81, %c0_82, %c0_83] : memref<1x4x128xbf16, #tpu.memory_space<vmem>>, vector<1x4x128xbf16>
    %276 = vector.shape_cast %275 : vector<1x4x128xbf16> to vector<4x128xbf16>
    %277 = vector.shape_cast %274 : vector<4x128xbf16> to vector<1x4x128xbf16>
    tpu.vector_store %arg12[%c0_81, %c0_82, %c0_83], %277 {strides = array<i32>} : memref<1x4x128xbf16, #tpu.memory_space<vmem>>, vector<1x4x128xbf16>,
    return
  }
  func.func @transform_0(%arg0: i32) -> (i32, i32, i32) {
    %c0_i32 = arith.constant 0 : i32
    %c0_i32_0 = arith.constant 0 : i32
    %c0_i32_1 = arith.constant 0 : i32
    return %arg0, %c0_i32, %c0_i32_0 : i32, i32, i32
  }
  func.func @transform_1(%arg0: i32) -> (i32, i32, i32) {
    %c0_i32 = arith.constant 0 : i32
    %c0_i32_0 = arith.constant 0 : i32
    %c0_i32_1 = arith.constant 0 : i32
    return %arg0, %c0_i32, %c0_i32_0 : i32, i32, i32
  }
  func.func @transform_2(%arg0: i32) -> (i32, i32) {
    %c0_i32 = arith.constant 0 : i32
    %c0_i32_0 = arith.constant 0 : i32
    %c0_i32_1 = arith.constant 0 : i32
    return %c0_i32, %c0_i32_0 : i32, i32
  }
  func.func @transform_3(%arg0: i32) -> (i32, i32) {
    %c0_i32 = arith.constant 0 : i32
    %c0_i32_0 = arith.constant 0 : i32
    %c0_i32_1 = arith.constant 0 : i32
    return %c0_i32, %c0_i32_0 : i32, i32
  }
  func.func @transform_4(%arg0: i32) -> (i32, i32) {
    %c0_i32 = arith.constant 0 : i32
    %c0_i32_0 = arith.constant 0 : i32
    %c0_i32_1 = arith.constant 0 : i32
    return %c0_i32, %c0_i32_0 : i32, i32
  }
  func.func @transform_5(%arg0: i32) -> (i32, i32) {
    %c0_i32 = arith.constant 0 : i32
    %c0_i32_0 = arith.constant 0 : i32
    %c0_i32_1 = arith.constant 0 : i32
    return %c0_i32, %c0_i32_0 : i32, i32
  }
  func.func @transform_6(%arg0: i32) -> (i32, i32) {
    %c0_i32 = arith.constant 0 : i32
    %c0_i32_0 = arith.constant 0 : i32
    %c0_i32_1 = arith.constant 0 : i32
    return %c0_i32, %c0_i32_0 : i32, i32
  }
  func.func @transform_7(%arg0: i32) -> (i32, i32) {
    %c0_i32 = arith.constant 0 : i32
    %c0_i32_0 = arith.constant 0 : i32
    %c0_i32_1 = arith.constant 0 : i32
    return %c0_i32, %c0_i32_0 : i32, i32
  }
  func.func @transform_8(%arg0: i32) -> (i32, i32) {
    %c0_i32 = arith.constant 0 : i32
    %c0_i32_0 = arith.constant 0 : i32
    %c0_i32_1 = arith.constant 0 : i32
    return %c0_i32, %c0_i32_0 : i32, i32
  }
  func.func @transform_9(%arg0: i32) -> (i32, i32) {
    %c0_i32 = arith.constant 0 : i32
    %c0_i32_0 = arith.constant 0 : i32
    %c0_i32_1 = arith.constant 0 : i32
    return %c0_i32, %c0_i32_0 : i32, i32
  }
  func.func @transform_10(%arg0: i32) -> (i32, i32, i32) {
    %c0_i32 = arith.constant 0 : i32
    %c0_i32_0 = arith.constant 0 : i32
    %c0_i32_1 = arith.constant 0 : i32
    return %arg0, %c0_i32, %c0_i32_0 : i32, i32, i32
  }
  func.func @transform_11(%arg0: i32) -> (i32, i32, i32) {
    %c0_i32 = arith.constant 0 : i32
    %c0_i32_0 = arith.constant 0 : i32
    %c0_i32_1 = arith.constant 0 : i32
    return %arg0, %c0_i32, %c0_i32_0 : i32, i32, i32
  }
}

</mosaic_0001>

<bundles_post_ra>
// kernel: tpu_custom_call.1
= control target key start
LH: loop header
LB: loop body
LE: loop exit
PB: predicated region body
PF: predicated region fallthrough
CT: control target
= control target key end

     0   :  { %s2372_s0 = inlined_call_operand.vmem [shape: bf16[2,8,128], index: 0, kind: input, shape index: {}]   ;;  %s2373_s1 = inlined_call_operand.vmem [shape: bf16[2,4,128], index: 1, kind: input, shape index: {}]   ;;  %s2374_s2 = inlined_call_operand.vmem [shape: bf16[128,96], index: 2, kind: input, shape index: {}]   ;;  %s2375_s3 = inlined_call_operand.vmem [shape: bf16[128,64], index: 3, kind: input, shape index: {}]   ;;  %s2376_s4 = inlined_call_operand.vmem [shape: bf16[32,128], index: 4, kind: input, shape index: {}]   ;;  %s2377_s5 = inlined_call_operand.vmem [shape: bf16[32,128], index: 5, kind: input, shape index: {}]   ;;  %s2378_s6 = inlined_call_operand.vmem [shape: f32[1,128], index: 6, kind: input, shape index: {}]   ;;  %s2379_s7 = inlined_call_operand.vmem [shape: f32[1,128], index: 7, kind: input, shape index: {}]   ;;  %s2380_s8 = inlined_call_operand.vmem [shape: f32[1,128], index: 8, kind: input, shape index: {}]   ;;  %s2381_s9 = inlined_call_operand.vmem [shape: f32[1,128], index: 9, kind: input, shape index: {}]   ;;  %s2382_s10 = inlined_call_operand.hbm [shape: bf16[2,8,128], index: 10, kind: output, shape index: {0}]   ;;  %s2383_s11 = inlined_call_operand.hbm [shape: bf16[2,4,128], index: 11, kind: output, shape index: {1}]  }
   0x1   :  { %2387 = sst [smem:[#allocation11_spill]] %s2372_s0 }
   0x2   :  { %2388 = sst [smem:[#allocation12_spill]] %s2373_s1 }
   0x3   :  { %2389 = sst [smem:[#allocation13_spill]] %s2374_s2 }
   0x4   :  { %17 = vsyncpa [#allocation3], 0 }
   0x5   :  { %19 = vsyncpa [#allocation3 + $0x1], 0 }
   0x6   :  { %20 = vsyncpa [#allocation5], 0 }
   0x7   :  { %22 = vsyncpa [#allocation5 + $0x1], 0  ;;  %s1990_s17 = smov 0   ;;  %s1992_s18 = smov 0  }
   0x8   :  { %s1994_s19 = smov 0   ;;  %s1996_s20 = smov 0  }
   0x9 LB: > { %2390 = sst [smem:[#allocation8_spill]] %s1908_s19  ;;  %s2011_s21 = sadd.s32 4294967295, %s1912_s20   ;;  %s1912_s20 = sphi %s1996_s20, %s2398_s20   ;;  %s1908_s19 = sphi %s1994_s19, %s2400_s19   ;;  %s1904_s18 = sphi %s1992_s18, %s2402_s18   ;;  %s1900_s17 = sphi %s1990_s17, %s2401_s17  }
   0xa   : > { %s1568_s22 = sadd.s32 4294967294, %s1912_s20   ;;  %s2015_s23 = sadd.s32 1, %s1912_s20  }
   0xb   : > { %2391 = sst [smem:[#allocation9_spill]] %s2015_s23  ;;  %s255_s24 = sadd.s32 1, %s1908_s19 }
   0xc   : > { %s252_s25 = ssub.s32 %s1912_s20, %s2015_s23  ;;  %p265_p0 = scmp.ne.s32.totalorder %s1908_s19, %s1904_s18 }
   0xd   : > { %p253_p1 = scmp.eq.s32.totalorder %s252_s25, 0  ;;  %p266_p2 = scmp.eq.s32.totalorder %s2011_s21, 1 }
   0xe   : > { %p271_p3 = scmp.ne.s32.totalorder %s1904_s18, %s1900_s17  ;;  %p272_p4 = scmp.eq.s32.totalorder %s1568_s22, 1 }
   0xf   : > { %s2026_s26 = scalar_select %p253_p1, %s1908_s19, %s255_s24  }
  0x10   : > { %p2028_p5 = por %p266_p2, %p265_p0  ;;  %p2032_p6 = por %p272_p4, %p271_p3 }
  0x11   : > { %2392 = sst [smem:[#allocation10_spill]] %s2026_s26  ;;  %p1571_p7 = scmp.ge.s32.totalorder %s1912_s20, 1 }
  0x12   : > { %p354_p8 = scmp.lt.s32.totalorder %s1912_s20, 3 }
  0x14   : > { %p355_p9 = pnand %p1571_p7, %p354_p8 }
  0x15   : > { %s2395_s2 = sld [smem:[#allocation13_spill]] (!%p355_p9)  ;;  %p402_p10 = scmp.lt.s32.totalorder (!%p355_p9), %s2011_s21, 1 }
  0x16   : > { %358 = sbr.rel (%p355_p9) target bundleno = 2148 (0x864), region = 60  ;;  %s2396_s1 = sld [smem:[#allocation12_spill]] (!%p355_p9) }
  0x17   : > { %s2397_s0 = sld [smem:[#allocation11_spill]] (!%p355_p9)  ;;  %s1914_s19 = smov (!%p355_p9), 32  }
  0x18   : > { %s1915_s23 = smov (!%p355_p9), 96   ;;  %s1919_s29 = smov (!%p355_p9), 104  }
  0x19   : > { %s1920_s30 = smov (!%p355_p9), 64   ;;  %s1921_s13 = smov (!%p355_p9), 112  }
  0x1a   : > { %s1922_s15 = smov (!%p355_p9), 72   ;;  %s1923_s16 = smov (!%p355_p9), 56  }
  0x1b   : > { %v1696_v0 = vld [vmem:[%s2375_s3 + $0x38] sm:$0xff]  ;;  %v1695_v1 = vld [vmem:[%s2375_s3 + $0x30] sm:$0xff]  ;;  %v1694_v4 = vld [vmem:[%s2375_s3 + $0x28] sm:$0xff]  ;;  %s403_s12 = scalar_select %p402_p10, %s2011_s21, 1  ;;  %vm741_vm0 = vcmask 126016   ;;  %vm567_vm1 = vcmask 60416  }
  0x1c   : > { %554 = vmatpush.bf16.msra.mxu1 %v1696_v0  ;;  %v1688_v2 = vld [vmem:[%s2395_s2 + $0x38] sm:$0xff]  ;;  %v1687_v3 = vld [vmem:[%s2395_s2 + $0x30] sm:$0xff]  ;;  %v1686_v5 = vld [vmem:[%s2395_s2 + $0x28] sm:$0xff]  ;;  %vm598_vm2 = vcmask 64512   ;;  %vm580_vm3 = vcmask 322816   ;;  %vm1084_vm4 = vcmask 257216  }
  0x1d   : > { %477 = vmatpush.bf16.msra.mxu0 %v1688_v2  ;;  %v1693_v6 = vld [vmem:[%s2375_s3 + $0x20] sm:$0xff]  ;;  %v1692_v8 = vld [vmem:[%s2375_s3 + $0x18] sm:$0xff]  ;;  %v1691_v10 = vld [vmem:[%s2375_s3 + $0x10] sm:$0xff]  ;;  %s1575_s22 = sshll.u32 %s403_s12, 1  ;;  %s1574_s26 = sshll.u32 %s403_s12, 2  ;;  %vm913_vm5 = vcmask 191616  }
  0x1e   : > { %v1685_v7 = vld [vmem:[%s2395_s2 + $0x20] sm:$0xff]  ;;  %v1684_v9 = vld [vmem:[%s2395_s2 + $0x18] sm:$0xff]  ;;  %v1683_v11 = vld [vmem:[%s2395_s2 + $0x10] sm:$0xff]  ;;  %s2088_s14 = scalar_lea.vmem %s2396_s1, %s1575_s22  ;;  %s2096_s25 = scalar_lea.vmem %s2397_s0, %s1574_s26  ;;  %vm650_vm7 = vcmask 1043456   ;;  %vm754_vm11 = vcmask 388416   ;;  %vm1097_vm12 = vcmask 519616  }
  0x1f   : > { %v1690_v12 = vld [vmem:[%s2375_s3 + $0x8] sm:$0xff]  ;;  %v1689_v14 = vld [vmem:[%s2375_s3] sm:$0xff]  ;;  %s1916_s26 = smov 88   ;;  %s1917_s12 = smov 120   ;;  %vm926_vm13 = vcmask 454016  }
  0x20   : > { %555 = vmatpush.bf16.msra.mxu1 %v1695_v1  ;;  %v1682_v13 = vld [vmem:[%s2395_s2 + $0x8] sm:$0xff]  ;;  %v1681_v15 = vld [vmem:[%s2395_s2] sm:$0xff]  ;;  %s1918_s22 = smov 80   ;;  %s1924_s24 = smov 48  }
  0x21   : > { %478 = vmatpush.bf16.msra.mxu0 %v1687_v3  ;;  %v412_v16 = vld [vmem:[%s2088_s14] sm:$0x3] }
  0x22   : > { %v411_v17 = vld [vmem:[%s2096_s25] sm:$0xf] }
  0x24   : > { %556 = vmatpush.bf16.msra.mxu1 %v1694_v4 }
  0x25   : > { %479 = vmatpush.bf16.msra.mxu0 %v1686_v5 }
  0x28   : > { %557 = vmatpush.bf16.msra.mxu1 %v1693_v6 }
  0x29   : > { %480 = vmatpush.bf16.msra.mxu0 %v1685_v7 }
  0x2c   : > { %558 = vmatpush.bf16.msra.mxu1 %v1692_v8 }
  0x2d   : > { %481 = vmatpush.bf16.msra.mxu0 %v1684_v9 }
  0x30   : > { %559 = vmatpush.bf16.msra.mxu1 %v1691_v10 }
  0x31   : > { %482 = vmatpush.bf16.msra.mxu0 %v1683_v11 }
  0x34   : > { %560 = vmatpush.bf16.msra.mxu1 %v1690_v12 }
  0x35   : > { %483 = vmatpush.bf16.msra.mxu0 %v1682_v13 }
  0x38   : > { %561 = vmatpush.bf16.msra.mxu1 %v1689_v14 }
  0x39   : > { %484 = vmatpush.bf16.msra.mxu0 %v1681_v15 }
  0x3b   : > { %562 = vmatmul.bf16.vlgmr.msra.gmra.mxu1 %v412_v16 }
  0x3c   : > { %485 = vmatmul.bf16.vlgmr.msra.gmra.mxu0 %v411_v17 }
  0xb8   : > { %v2100_v18 = vpop.f32.mrf.mxu1 }
  0xb9   : > { %v742_v19 = vsel %vm741_vm0, %v2100_v18, 0.0  ;;  %v568_v20 = vsel %vm567_vm1, %v2100_v18, 0.0  ;;  %v2107_v34 = vpop.f32.mrf.mxu0  ;;  %v581_v44 = vsel %vm580_vm3, %v2100_v18, 0.0  ;;  %v667_v55 = vmul.f32 0.35355338, %v2100_v18 }
  0xba   : > { %v743_v21 = vrot.slane %v742_v19, 4  ;;  %v569_v22 = vrot.slane %v568_v20, 4  ;;  %v2114_v41 = vpack.c.bf16 %v2107_v34, %v2107_v34  ;;  %v582_v45 = vrot.slane %v581_v44, 4 }
  0xbb   : > { %v2124_v56 = vpack.c.bf16 %v667_v55, %v667_v55  ;;  %v1085_v62 = vsel %vm1084_vm4, %v2100_v18, 0.0  ;;  %v914_v63 = vsel %vm913_vm5, %v2100_v18, 0.0 }
  0xbc   : > { %v744_v23 = vadd.f32 %v743_v21, %v742_v19  ;;  %v570_v24 = vadd.f32 %v569_v22, %v568_v20  ;;  %v583_v47 = vadd.f32 %v582_v45, %v581_v44  ;;  %v1086_v0 = vrot.slane %v1085_v62, 4 }
  0xbd   : > { %v915_v1 = vrot.slane %v914_v63, 4  ;;  %v755_v45 = vsel %vm754_vm11, %v2100_v18, 0.0 }
  0xbe   : > { %v745_v25 = vrot.slane %v744_v23, 2  ;;  %v571_v26 = vrot.slane %v570_v24, 2  ;;  %v584_v48 = vrot.slane %v583_v47, 2  ;;  %v1087_v2 = vadd.f32 %v1086_v0, %v1085_v62 }
  0xbf   : > { %v916_v3 = vadd.f32 %v915_v1, %v914_v63 }
  0xc0   : > { %v565_v27 = vpop.f32.mrf.mxu1  ;;  %v746_v28 = vadd.f32 %v745_v25, %v744_v23  ;;  %v572_v29 = vadd.f32 %v571_v26, %v570_v24  ;;  %v585_v49 = vadd.f32 %v584_v48, %v583_v47  ;;  %v1088_v4 = vrot.slane %v1087_v2, 2 }
  0xc1   : > { %v488_v35 = vpop.f32.mrf.mxu0  ;;  %v917_v5 = vrot.slane %v916_v3, 2 }
  0xc2   : > { %v747_v30 = vrot.slane %v746_v28, 1  ;;  %v573_v31 = vrot.slane %v572_v29, 1  ;;  %v586_v50 = vrot.slane %v585_v49, 1  ;;  %v1089_v9 = vadd.f32 %v1088_v4, %v1087_v2 }
  0xc3   : > { %v918_v10 = vadd.f32 %v917_v5, %v916_v3 }
  0xc4   : > { %v748_v32 = vadd.f32 %v747_v30, %v746_v28  ;;  %v574_v33 = vadd.f32 %v573_v31, %v572_v29  ;;  %v587_v51 = vadd.f32 %v586_v50, %v585_v49  ;;  %v1090_v11 = vrot.slane %v1089_v9, 1 }
  0xc5   : > { %v919_v12 = vrot.slane %v918_v10, 1 }
  0xc6   : > { %750 = vrot.lane.b32.xlu2 %v748_v32, %s1914_s19  ;;  %576 = vrot.lane.b32.xlu0 %v574_v33, %s1914_s19  ;;  %v1091_v13 = vadd.f32 %v1090_v11, %v1089_v9 }
  0xc7   : > { %v920_v14 = vadd.f32 %v919_v12, %v918_v10 }
 0x120   : > { %v751_v52 = vpop.permute.xlu2 %750 }
 0x121   : > { %v753_v53 = vadd.f32 %v751_v52, %v2107_v34 }
 0x123   : > { %v767_v54 = vpack.c.bf16 %v753_v53, %v753_v53  ;;  %v1098_v53 = vsel %vm1097_vm12, %v2100_v18, 0.0 }
 0x124   : > { %v1099_v55 = vrot.slane %v1098_v53, 4 }
 0x138   : > { %v577_v36 = vpop.permute.xlu0 %576 }
 0x139   : > { %v579_v37 = vadd.f32 %v577_v36, %v2107_v34 }
 0x13b   : > { %v594_v38 = vpack.c.bf16 %v579_v37, %v579_v37 }
 0x13d   : > { %596 = vrot.lane.b32.xlu0 %v594_v38, %s1915_s23 }
 0x1af   : > { %v597_v39 = vpop.permute.xlu0 %596 }
 0x1b0   : > { %v603_v40 = vsel %vm598_vm2, %v597_v39, 0 }
 0x1b1   : > { %612 = vmatpush.bf16.xpose.msra.mxu2 %v603_v40 }
 0x1b8   : > { %1640 = vmatmul.msk.bf16.vlgmr.msra.gmra.mxu2 %vm598_vm2, %v2114_v41 }
 0x23b   : > { %v614_v42 = vpop.f32.mrf.mxu2 }
 0x23c   : > { %v618_v43 = vsel %vm598_vm2, %v614_v42, -inf }
 0x23d   : > { %619 = vmax.xlane.f32.xlu1 %v618_v43 }
 0x243   : > { %v616_v46 = vpop.f32.mrf.mxu2 }
 0x244   : > { %v756_v46 = vrot.slane %v755_v45, 4 }
 0x246   : > { %v757_v50 = vadd.f32 %v756_v46, %v755_v45 }
 0x256   : > { %589 = vrot.lane.b32.xlu1 %v587_v51, %s1914_s19  ;;  %v758_v51 = vrot.slane %v757_v50, 2 }
 0x258   : > { %v759_v52 = vadd.f32 %v758_v51, %v757_v50 }
 0x25e   : > { %771 = vrot.lane.b32.xlu1 %v767_v54, %s1916_s26  ;;  %v760_v54 = vrot.slane %v759_v52, 1 }
 0x266   : > { %841 = vrot.lane.b32.xlu1 %v2124_v56, %s1917_s12 }
 0x26e   : > { %1014 = vrot.lane.b32.xlu1 %v2114_v41, %s1918_s22 }
 0x276   : > { %1111 = vrot.lane.b32.xlu1 %v2114_v41, %s1919_s29 }
 0x2b0   : > { %v620_v57 = vpop.xlane.xlu1 %619 }
 0x2b1   : > { %v621_v58 = vsub.f32 %v614_v42, %v620_v57  ;;  %v761_v57 = vadd.f32 %v760_v54, %v759_v52 }
 0x2b3   : > { %v622_v59 = vmul.f32 1.442695, %v621_v58  ;;  %v1100_v58 = vadd.f32 %v1099_v55, %v1098_v53 }
 0x2b5   : > { %1780 = vpow2.f32 %v622_v59  ;;  %v1101_v59 = vrot.slane %v1100_v58, 2 }
 0x2bb   : > { %v1781_v60 = vpop.eup %1780 }
 0x2bc   : > { %v624_v61 = vsel %vm598_vm2, %v1781_v60, 0.0 }
 0x2bd   : > { %625 = vadd.xlane.f32.xlu2 %v624_v61  ;;  %v1102_v61 = vadd.f32 %v1101_v59, %v1100_v58 }
 0x2c8   : > { %v590_v6 = vpop.permute.xlu1 %589 }
 0x2c9   : > { %v592_v7 = vadd.f32 %v590_v6, %v2107_v34 }
 0x2cb   : > { %v643_v8 = vpack.c.bf16 %v592_v7, %v592_v7 }
 0x2cd   : > { %645 = vrot.lane.b32.xlu0 %v643_v8, %s1920_s30 }
 0x2d0   : > { %v772_v15 = vpop.permute.xlu1 %771 }
 0x2d1   : > { %v777_v49 = vsel %vm598_vm2, %v772_v15, 0 }
 0x2d5   : > { %1093 = vrot.lane.b32.xlu2 %v1091_v13, %s1914_s19  ;;  %922 = vrot.lane.b32.xlu0 %v920_v14, %s1914_s19 }
 0x2d8   : > { %v842_v17 = vpop.permute.xlu1 %841 }
 0x2dd   : > { %843 = vrot.lane.b32.xlu2 %v2114_v41, %s1916_s26  ;;  %670 = vrot.lane.b32.xlu0 %v2114_v41, %s1915_s23 }
 0x2e0   : > { %v1015_v29 = vpop.permute.xlu1 %1014 }
 0x2e1   : > { %v1020_v38 = vsel %vm598_vm2, %v1015_v29, 0 }
 0x2e5   : > { %940 = vrot.lane.b32.xlu2 %v2114_v41, %s1921_s13  ;;  %768 = vrot.lane.b32.xlu0 %v2114_v41, %s1917_s12  ;;  %s1928_s12 = smov 24  }
 0x2e8   : > { %v1112_v12 = vpop.permute.xlu1 %1111 }
 0x330   : > { %v626_v16 = vpop.xlane.xlu2 %625 }
 0x331   : > { %1782 = vrcp.f32 %v626_v16  ;;  %v638_v24 = vand.u32 2147483648, %v626_v16  ;;  %v636_v27 = vand.u32 2147483647, %v626_v16  ;;  %vm632_vm8 = vweird.f32 %v626_v16 }
 0x333   : > { %v639_v30 = vor.u32 1.1754944e-38, %v638_v24  ;;  %vm637_vm10 = vcmp.eq.f32.partialorder %v636_v27, 8.507059e+37 }
 0x337   : > { %v1783_v19 = vpop.eup %1782 }
 0x338   : > { %v628_v20 = vmul.f32 %v1783_v19, %v626_v16  ;;  %v1094_v21 = vpop.permute.xlu2 %1093  ;;  %vm633_vm6 = vweird.f32 %v1783_v19 }
 0x339   : > { %v1096_v22 = vadd.f32 %v1094_v21, %v2107_v34  ;;  %vm634_vm9 = vmor %vm632_vm8, %vm633_vm6 }
 0x33a   : > { %v629_v23 = vsub.f32 1.0, %v628_v20 }
 0x33b   : > { %v1110_v25 = vpack.c.bf16 %v1096_v22, %v1096_v22 }
 0x33c   : > { %v630_v26 = vmul.f32 %v1783_v19, %v629_v23 }
 0x33d   : > { %1114 = vrot.lane.b32.xlu2 %v1110_v25, %s1922_s15 }
 0x33e   : > { %v631_v28 = vadd.f32 %v1783_v19, %v630_v26 }
 0x33f   : > { %v646_v31 = vpop.permute.xlu0 %645 }
 0x340   : > { %v844_v32 = vpop.permute.xlu2 %843  ;;  %v652_v33 = vsel %vm650_vm7, %v646_v31, 0  ;;  %v635_v35 = vsel %vm634_vm9, %v1783_v19, %v631_v28 }
 0x341   : > { %661 = vmatpush.bf16.msra.mxu3 %v652_v33  ;;  %v849_v36 = vsel %vm598_vm2, %v844_v32, 0  ;;  %v640_v37 = vsel %vm637_vm10, %v639_v30, %v635_v35 }
 0x342   : > { %858 = vmatpush.bf16.xpose.msrb.mxu0 %v849_v36  ;;  %v641_v39 = vmul.f32 %v1781_v60, %v640_v37 }
 0x344   : > { %v642_v40 = vpack.c.bf16 %v641_v39, %v641_v39  ;;  %v927_v39 = vsel %vm926_vm13, %v2100_v18, 0.0 }
 0x345   : > { %1183 = vrot.lane.b32.xlu2 %v2124_v56, %s1919_s29  ;;  %s1678_s29 = sshll.u32 %s2011_s21, 1 }
 0x346   : > { %1641 = vmatmul.msk.bf16.vlgmr.msra.gmra.mxu3 %vm598_vm2, %v642_v40  ;;  %v928_v40 = vrot.slane %v927_v39, 4 }
 0x347   : > { %v923_v42 = vpop.permute.xlu0 %922 }
 0x348   : > { %v925_v43 = vadd.f32 %v923_v42, %v2107_v34  ;;  %v941_v63 = vpop.permute.xlu2 %940 }
 0x349   : > { %1646 = vmatmul.msk.bf16.vlgmr.msrb.gmra.mxu0 %vm598_vm2, %v842_v17 }
 0x34a   : > { %1029 = vmatpush.bf16.xpose.msra.mxu0 %v1020_v38  ;;  %v939_v44 = vpack.c.bf16 %v925_v43, %v925_v43 }
 0x34c   : > { %943 = vrot.lane.b32.xlu0 %v939_v44, %s1918_s22  ;;  %v929_v44 = vadd.f32 %v928_v40, %v927_v39 }
 0x34e   : > { %v930_v45 = vrot.slane %v929_v44, 2 }
 0x34f   : > { %v671_v47 = vpop.permute.xlu0 %670 }
 0x350   : > { %v676_v48 = vsel %vm598_vm2, %v671_v47, 0 }
 0x351   : > { %685 = vmatpush.bf16.xpose.msrb.mxu3 %v676_v48  ;;  %v931_v48 = vadd.f32 %v930_v45, %v929_v44 }
 0x354   : > { %1012 = vrot.lane.b32.xlu0 %v2124_v56, %s1921_s13 }
 0x357   : > { %v769_v60 = vpop.permute.xlu0 %768 }
 0x358   : > { %1642 = vmatmul.msk.bf16.vlgmr.msrb.gmra.mxu3 %vm598_vm2, %v2124_v56  ;;  %v1103_v56 = vrot.slane %v1102_v61, 1 }
 0x359   : > { %786 = vmatpush.bf16.xpose.msra.mxu3 %v777_v49  ;;  %v932_v49 = vrot.slane %v931_v48, 1 }
 0x35a   : > { %v1104_v62 = vadd.f32 %v1103_v56, %v1102_v61 }
 0x35b   : > { %v933_v51 = vadd.f32 %v932_v49, %v931_v48 }
 0x35c   : > { %1185 = vrot.lane.b32.xlu0 %v2114_v41, %s1922_s15 }
 0x364   : > { %763 = vrot.lane.b32.xlu0 %v761_v57, %s1914_s19 }
 0x368   : > { %1644 = vmatmul.msk.bf16.vlgmr.msra.gmra.mxu3 %vm598_vm2, %v769_v60 }
 0x36c   : > { %716 = vrot.lane.b32.xlu0 %v2114_v41, %s1920_s30  ;;  %s1459_s30 = scalar_lea.hbm %s2383_s11, %s1678_s29 }
 0x374   : > { %1106 = vrot.lane.b32.xlu0 %v1104_v62, %s1914_s19 }
 0x397   : > { %v1115_v0 = vpop.permute.xlu2 %1114 }
 0x398   : > { %v1120_v3 = vsel %vm598_vm2, %v1115_v0, 0 }
 0x39f   : > { %v1184_v13 = vpop.permute.xlu2 %1183 }
 0x3be   : > { %v944_v1 = vpop.permute.xlu0 %943 }
 0x3bf   : > { %v949_v2 = vsel %vm598_vm2, %v944_v1, 0 }
 0x3c0   : > { %958 = vmatpush.bf16.xpose.msrb.mxu3 %v949_v2 }
 0x3c6   : > { %v1013_v4 = vpop.permute.xlu0 %1012  ;;  %v860_v5 = vpop.f32.mrf.mxu0 }
 0x3c7   : > { %1648 = vmatmul.msk.bf16.vlgmr.msrb.gmra.mxu3 %vm598_vm2, %v941_v63  ;;  %1650 = vmatmul.msk.bf16.vlgmr.msra.gmra.mxu0 %vm598_vm2, %v1013_v4  ;;  %v864_v6 = vsel %vm567_vm1, %v860_v5, -inf }
 0x3c8   : > { %1129 = vmatpush.bf16.xpose.msra.mxu3 %v1120_v3  ;;  %865 = vmax.xlane.f32.xlu2 %v864_v6 }
 0x3c9   : > { %v2178_v7 = vpop.f32.mrf.mxu3 }
 0x3ce   : > { %v1186_v8 = vpop.permute.xlu0 %1185  ;;  %v862_v9 = vpop.f32.mrf.mxu0 }
 0x3cf   : > { %v1191_v10 = vsel %vm598_vm2, %v1186_v8, 0 }
 0x3d0   : > { %1200 = vmatpush.bf16.xpose.msrb.mxu0 %v1191_v10 }
 0x3d1   : > { %v665_v11 = vpop.f32.mrf.mxu3 }
 0x3d6   : > { %v764_v14 = vpop.permute.xlu0 %763 }
 0x3d7   : > { %1652 = vmatmul.msk.bf16.vlgmr.msra.gmra.mxu3 %vm598_vm2, %v1112_v12  ;;  %1654 = vmatmul.msk.bf16.vlgmr.msrb.gmra.mxu0 %vm598_vm2, %v1184_v13  ;;  %v766_v23 = vadd.f32 %v764_v14, %v2107_v34 }
 0x3d9   : > { %v817_v24 = vpack.c.bf16 %v766_v23, %v766_v23 }
 0x3db   : > { %v2183_v15 = vpop.f32.mrf.mxu3 }
 0x3dc   : > { %v691_v35 = vsel %vm567_vm1, %v2183_v15, -inf }
 0x3de   : > { %v717_v16 = vpop.permute.xlu0 %716 }
 0x3df   : > { %v726_v17 = vsel %vm650_vm7, %v717_v16, 0 }
 0x3e0   : > { %735 = vmatpush.bf16.msrb.mxu2 %v726_v17 }
 0x3e3   : > { %v689_v19 = vpop.f32.mrf.mxu3 }
 0x3e6   : > { %v2208_v47 = vpop.permute.xlu0 %1106 }
 0x3eb   : > { %v2186_v20 = vpop.f32.mrf.mxu3 }
 0x3ec   : > { %v792_v21 = vsel %vm598_vm2, %v2186_v20, -inf }
 0x3ed   : > { %793 = vmax.xlane.f32.xlu0 %v792_v21 }
 0x3f3   : > { %v790_v22 = vpop.f32.mrf.mxu3 }
 0x401   : > { %819 = vrot.lane.b32.xlu0 %v817_v24, %s1923_s16 }
 0x43b   : > { %v866_v25 = vpop.xlane.xlu2 %865 }
 0x43c   : > { %v867_v26 = vsub.f32 %v860_v5, %v866_v25 }
 0x43e   : > { %v868_v27 = vmul.f32 1.442695, %v867_v26 }
 0x440   : > { %1784 = vpow2.f32 %v868_v27 }
 0x444   : > { %v1031_v28 = vpop.f32.mrf.mxu0 }
 0x445   : > { %v1035_v29 = vsel %vm567_vm1, %v1031_v28, -inf }
 0x446   : > { %v2193_v30 = vpop.eup %1784  ;;  %1036 = vmax.xlane.f32.xlu2 %v1035_v29 }
 0x447   : > { %v870_v31 = vsel %vm567_vm1, %v2193_v30, 0.0 }
 0x448   : > { %871 = vadd.xlane.f32.xlu1 %v870_v31 }
 0x44a   : > { %v2197_v32 = vpop.f32.mrf.mxu3 }
 0x44b   : > { %v964_v54 = vsel %vm598_vm2, %v2197_v32, -inf }
 0x44c   : > { %v1033_v33 = vpop.f32.mrf.mxu0 }
 0x450   : > { %692 = vmax.xlane.f32.xlu1 %v691_v35 }
 0x452   : > { %v962_v36 = vpop.f32.mrf.mxu3 }
 0x453   : > { %v1109_v36 = vadd.f32 %v2208_v47, %v2107_v34 }
 0x454   : > { %v2201_v37 = vpop.f32.mrf.mxu0 }
 0x455   : > { %v1206_v38 = vsel %vm567_vm1, %v2201_v37, -inf  ;;  %v1160_v39 = vpack.c.bf16 %v1109_v36, %v1109_v36 }
 0x456   : > { %1207 = vmax.xlane.f32.xlu2 %v1206_v38 }
 0x45a   : > { %v2206_v42 = vpop.f32.mrf.mxu3 }
 0x45b   : > { %v1135_v55 = vsel %vm598_vm2, %v2206_v42, -inf }
 0x45c   : > { %v1204_v43 = vpop.f32.mrf.mxu0 }
 0x460   : > { %v794_v50 = vpop.xlane.xlu0 %793 }
 0x461   : > { %v795_v2 = vsub.f32 %v2186_v20, %v794_v50 }
 0x462   : > { %v1133_v46 = vpop.f32.mrf.mxu3 }
 0x463   : > { %v796_v5 = vmul.f32 1.442695, %v795_v2 }
 0x469   : > { %889 = vrot.lane.b32.xlu1 %v2114_v41, %s1923_s16  ;;  %s1463_s16 = sshll.u32 %s1459_s30, 4  ;;  %s2328_s16 = int_to_ptr.hbm [resolvable:$true] %s1463_s16 }
 0x46e   : > { %935 = vrot.lane.b32.xlu2 %v933_v51, %s1914_s19  ;;  %s1925_s19 = smov 40  }
 0x473   : > { %v820_v52 = vpop.permute.xlu0 %819 }
 0x474   : > { %v825_v53 = vsel %vm650_vm7, %v820_v52, 0 }
 0x475   : > { %834 = vmatpush.bf16.msra.mxu2 %v825_v53 }
 0x493   : > { %965 = vmax.xlane.f32.xlu1 %v964_v54 }
 0x49b   : > { %1136 = vmax.xlane.f32.xlu1 %v1135_v55 }
 0x4b9   : > { %v1037_v57 = vpop.xlane.xlu2 %1036 }
 0x4ba   : > { %v1038_v58 = vsub.f32 %v1031_v28, %v1037_v57 }
 0x4bb   : > { %v872_v59 = vpop.xlane.xlu1 %871 }
 0x4bc   : > { %v1039_v60 = vmul.f32 1.442695, %v1038_v58  ;;  %1786 = vrcp.f32 %v872_v59  ;;  %v884_v11 = vand.u32 2147483648, %v872_v59  ;;  %vm878_vm15 = vweird.f32 %v872_v59 }
 0x4bd   : > { %v882_v12 = vand.u32 2147483647, %v872_v59 }
 0x4be   : > { %1788 = vpow2.f32 %v1039_v60 }
 0x4bf   : > { %vm883_vm3 = vcmp.eq.f32.partialorder %v882_v12, 8.507059e+37 }
 0x4c2   : > { %v1787_v61 = vpop.eup %1786 }
 0x4c3   : > { %v693_v56 = vpop.xlane.xlu1 %692  ;;  %v874_v63 = vmul.f32 %v1787_v61, %v872_v59  ;;  %vm879_vm14 = vweird.f32 %v1787_v61 }
 0x4c4   : > { %v2218_v62 = vpop.eup %1788  ;;  %v694_v0 = vsub.f32 %v2183_v15, %v693_v56  ;;  %vm880_vm0 = vmor %vm878_vm15, %vm879_vm14  ;;  %v885_v15 = vor.u32 1.1754944e-38, %v884_v11 }
 0x4c5   : > { %v1041_v1 = vsel %vm567_vm1, %v2218_v62, 0.0  ;;  %v875_v4 = vsub.f32 1.0, %v874_v63 }
 0x4c6   : > { %v695_v3 = vmul.f32 1.442695, %v694_v0  ;;  %1042 = vadd.xlane.f32.xlu2 %v1041_v1 }
 0x4c7   : > { %v876_v6 = vmul.f32 %v1787_v61, %v875_v4 }
 0x4c8   : > { %1790 = vpow2.f32 %v695_v3 }
 0x4c9   : > { %1792 = vpow2.f32 %v796_v5  ;;  %v877_v10 = vadd.f32 %v1787_v61, %v876_v6  ;;  %v1208_v31 = vpop.xlane.xlu2 %1207 }
 0x4ca   : > { %v1209_v46 = vsub.f32 %v2201_v37, %v1208_v31 }
 0x4cb   : > { %v881_v14 = vsel %vm880_vm0, %v1787_v61, %v877_v10 }
 0x4cc   : > { %v886_v17 = vsel %vm883_vm3, %v885_v15, %v881_v14  ;;  %v1210_v51 = vmul.f32 1.442695, %v1209_v46 }
 0x4cd   : > { %v887_v19 = vmul.f32 %v2193_v30, %v886_v17 }
 0x4ce   : > { %v2224_v8 = vpop.eup %1790 }
 0x4cf   : > { %v697_v9 = vsel %vm567_vm1, %v2224_v8, 0.0  ;;  %v2228_v13 = vpop.eup %1792  ;;  %v888_v22 = vpack.c.bf16 %v887_v19, %v887_v19 }
 0x4d0   : > { %698 = vadd.xlane.f32.xlu1 %v697_v9  ;;  %v798_v16 = vsel %vm598_vm2, %v2228_v13, 0.0 }
 0x4d8   : > { %799 = vadd.xlane.f32.xlu1 %v798_v16 }
 0x4db   : > { %v890_v20 = vpop.permute.xlu1 %889 }
 0x4dc   : > { %v898_v21 = vsel %vm650_vm7, %v890_v20, 0 }
 0x4dd   : > { %907 = vmatpush.bf16.msrb.mxu1 %v898_v21 }
 0x4de   : > { %1060 = vrot.lane.b32.xlu2 %v2114_v41, %s1924_s24 }
 0x4e0   : > { %1647 = vmatmul.msk.bf16.vlgmr.msrb.gmra.mxu1 %vm598_vm2, %v888_v22 }
 0x4e6   : > { %1231 = vrot.lane.b32.xlu2 %v2114_v41, %s1925_s19 }
 0x4ee   : > { %1062 = vrot.lane.b32.xlu2 %v2100_v18, %s1918_s22 }
 0x506   : > { %v966_v23 = vpop.xlane.xlu1 %965 }
 0x507   : > { %v967_v24 = vsub.f32 %v2197_v32, %v966_v23  ;;  %v936_v32 = vpop.permute.xlu2 %935 }
 0x508   : > { %v938_v35 = vadd.f32 %v936_v32, %v2107_v34 }
 0x509   : > { %v968_v25 = vmul.f32 1.442695, %v967_v24 }
 0x50a   : > { %v989_v38 = vpack.c.bf16 %v938_v35, %v938_v35 }
 0x50b   : > { %1794 = vpow2.f32 %v968_v25 }
 0x50e   : > { %v1137_v26 = vpop.xlane.xlu1 %1136 }
 0x50f   : > { %v1138_v27 = vsub.f32 %v2206_v42, %v1137_v26 }
 0x511   : > { %v2241_v28 = vpop.eup %1794  ;;  %v1139_v29 = vmul.f32 1.442695, %v1138_v27 }
 0x512   : > { %v970_v30 = vsel %vm598_vm2, %v2241_v28, 0.0 }
 0x513   : > { %1796 = vpow2.f32 %v1139_v29  ;;  %971 = vadd.xlane.f32.xlu1 %v970_v30 }
 0x519   : > { %v2245_v41 = vpop.eup %1796 }
 0x51a   : > { %v1141_v33 = vsel %vm598_vm2, %v2245_v41, 0.0 }
 0x51b   : > { %1142 = vadd.xlane.f32.xlu0 %v1141_v33 }
 0x52c   : > { %991 = vrot.lane.b32.xlu1 %v989_v38, %s1924_s24 }
 0x52f   : > { %1162 = vrot.lane.b32.xlu0 %v1160_v39, %s1925_s19  ;;  %s1838_s19 = scalar_lea.hbm %s2382_s10, 8 }
 0x537   : > { %891 = vrot.lane.b32.xlu0 %v2100_v18, %s1916_s26  ;;  %s1927_s26 = smov 16  }
 0x539   : > { %v1043_v40 = vpop.xlane.xlu2 %1042 }
 0x53a   : > { %1798 = vrcp.f32 %v1043_v40  ;;  %v1055_v48 = vand.u32 2147483648, %v1043_v40  ;;  %v1053_v50 = vand.u32 2147483647, %v1043_v40  ;;  %vm1049_vm5 = vweird.f32 %v1043_v40 }
 0x53c   : > { %v1056_v53 = vor.u32 1.1754944e-38, %v1055_v48  ;;  %vm1054_vm8 = vcmp.eq.f32.partialorder %v1053_v50, 8.507059e+37 }
 0x53f   : > { %1233 = vrot.lane.b32.xlu0 %v2100_v18, %s1922_s15 }
 0x540   : > { %v1799_v42 = vpop.eup %1798 }
 0x541   : > { %v1045_v43 = vmul.f32 %v1799_v42, %v1043_v40  ;;  %v1061_v44 = vpop.permute.xlu2 %1060  ;;  %vm1050_vm4 = vweird.f32 %v1799_v42 }
 0x542   : > { %v1069_v45 = vsel %vm650_vm7, %v1061_v44, 0  ;;  %vm1051_vm6 = vmor %vm1049_vm5, %vm1050_vm4 }
 0x543   : > { %v1046_v34 = vsub.f32 1.0, %v1045_v43  ;;  %v699_v47 = vpop.xlane.xlu1 %698  ;;  %1078 = vmatpush.bf16.msra.mxu1 %v1069_v45 }
 0x544   : > { %1800 = vrcp.f32 %v699_v47  ;;  %v711_v0 = vand.u32 2147483648, %v699_v47  ;;  %v709_v2 = vand.u32 2147483647, %v699_v47  ;;  %vm705_vm10 = vweird.f32 %v699_v47 }
 0x545   : > { %v1047_v49 = vmul.f32 %v1799_v42, %v1046_v34  ;;  %1802 = vpow2.f32 %v1210_v51 }
 0x546   : > { %v712_v6 = vor.u32 1.1754944e-38, %v711_v0  ;;  %vm710_vm12 = vcmp.eq.f32.partialorder %v709_v2, 8.507059e+37 }
 0x547   : > { %v1048_v52 = vadd.f32 %v1799_v42, %v1047_v49 }
 0x549   : > { %v1052_v54 = vsel %vm1051_vm6, %v1799_v42, %v1048_v52  ;;  %v1232_v55 = vpop.permute.xlu2 %1231 }
 0x54a   : > { %v1801_v57 = vpop.eup %1800  ;;  %v1057_v58 = vsel %vm1054_vm8, %v1056_v53, %v1052_v54  ;;  %v1240_v37 = vsel %vm650_vm7, %v1232_v55, 0 }
 0x54b   : > { %v1058_v59 = vmul.f32 %v2218_v62, %v1057_v58  ;;  %v701_v60 = vmul.f32 %v1801_v57, %v699_v47  ;;  %v800_v61 = vpop.xlane.xlu1 %799  ;;  %1249 = vmatpush.bf16.msrb.mxu1 %v1240_v37  ;;  %vm706_vm9 = vweird.f32 %v1801_v57  ;;  %v2261_v3 = vpop.eup %1802 }
 0x54c   : > { %1804 = vrcp.f32 %v800_v61  ;;  %vm707_vm11 = vmor %vm705_vm10, %vm706_vm9  ;;  %v1212_v12 = vsel %vm567_vm1, %v2261_v3, 0.0  ;;  %v812_v19 = vand.u32 2147483648, %v800_v61  ;;  %vm806_vm14 = vweird.f32 %v800_v61 }
 0x54d   : > { %v702_v56 = vsub.f32 1.0, %v701_v60  ;;  %v1059_v63 = vpack.c.bf16 %v1058_v59, %v1058_v59  ;;  %v810_v20 = vand.u32 2147483647, %v800_v61 }
 0x54e   : > { %v813_v23 = vor.u32 1.1754944e-38, %v812_v19 }
 0x54f   : > { %v703_v1 = vmul.f32 %v1801_v57, %v702_v56  ;;  %1651 = vmatmul.msk.bf16.vlgmr.msra.gmra.mxu1 %vm598_vm2, %v1059_v63  ;;  %vm811_vm0 = vcmp.eq.f32.partialorder %v810_v20, 8.507059e+37 }
 0x551   : > { %v704_v4 = vadd.f32 %v1801_v57, %v703_v1 }
 0x552   : > { %v1805_v5 = vpop.eup %1804 }
 0x553   : > { %v802_v62 = vmul.f32 %v1805_v5, %v800_v61  ;;  %v708_v9 = vsel %vm707_vm11, %v1801_v57, %v704_v4  ;;  %vm807_vm13 = vweird.f32 %v1805_v5 }
 0x554   : > { %v713_v10 = vsel %vm710_vm12, %v712_v6, %v708_v9  ;;  %vm808_vm15 = vmor %vm806_vm14, %vm807_vm13 }
 0x555   : > { %v803_v11 = vsub.f32 1.0, %v802_v62  ;;  %v714_v14 = vmul.f32 %v2224_v8, %v713_v10 }
 0x556   : > { %1213 = vadd.xlane.f32.xlu1 %v1212_v12 }
 0x557   : > { %v804_v15 = vmul.f32 %v1805_v5, %v803_v11  ;;  %v715_v16 = vpack.c.bf16 %v714_v14, %v714_v14 }
 0x559   : > { %v805_v17 = vadd.f32 %v1805_v5, %v804_v15  ;;  %1643 = vmatmul.msk.bf16.vlgmr.msrb.gmra.mxu2 %vm598_vm2, %v715_v16 }
 0x55b   : > { %v809_v21 = vsel %vm808_vm15, %v1805_v5, %v805_v17  ;;  %v1063_v17 = vpop.permute.xlu2 %1062  ;;  %vm1268_vm15 = vcmask 130048  }
 0x55c   : > { %v814_v24 = vsel %vm811_vm0, %v813_v23, %v809_v21  ;;  %vm1270_vm0 = vcmask 195584  }
 0x55d   : > { %v2267_v22 = vpop.f32.mrf.mxu1  ;;  %v815_v25 = vmul.f32 %v2228_v13, %v814_v24 }
 0x55f   : > { %v816_v26 = vpack.c.bf16 %v815_v25, %v815_v25 }
 0x565   : > { %v911_v8 = vpop.f32.mrf.mxu1 }
 0x569   : > { %1645 = vmatmul.msk.bf16.vlgmr.msra.gmra.mxu2 %vm598_vm2, %v816_v26 }
 0x56f   : > { %719 = vrot.lane.b32.xlu1 %v2100_v18, %s1915_s23  ;;  %s1926_s23 = smov 8  }
 0x586   : > { %v972_v27 = vpop.xlane.xlu1 %971 }
 0x587   : > { %1806 = vrcp.f32 %v972_v27  ;;  %v984_v36 = vand.u32 2147483648, %v972_v27  ;;  %vm978_vm3 = vweird.f32 %v972_v27  ;;  %v982_v13 = vand.u32 2147483647, %v972_v27 }
 0x589   : > { %v985_v42 = vor.u32 1.1754944e-38, %v984_v36  ;;  %vm983_vm5 = vcmp.eq.f32.partialorder %v982_v13, 8.507059e+37 }
 0x58d   : > { %v1807_v29 = vpop.eup %1806 }
 0x58e   : > { %v974_v30 = vmul.f32 %v1807_v29, %v972_v27  ;;  %v1143_v31 = vpop.xlane.xlu0 %1142  ;;  %vm979_vm1 = vweird.f32 %v1807_v29 }
 0x58f   : > { %1808 = vrcp.f32 %v1143_v31  ;;  %vm980_vm4 = vmor %vm978_vm3, %vm979_vm1  ;;  %v1155_v51 = vand.u32 2147483648, %v1143_v31  ;;  %vm1149_vm8 = vweird.f32 %v1143_v31  ;;  %v1153_v52 = vand.u32 2147483647, %v1143_v31 }
 0x590   : > { %v975_v33 = vsub.f32 1.0, %v974_v30  ;;  %v1700_v30 = vld [vmem:[%s2377_s5 + $0x8] sm:$0xff]  ;;  %vm1305_vm1 = vcmask 261120  }
 0x591   : > { %vm1154_vm10 = vcmp.eq.f32.partialorder %v1153_v52, 8.507059e+37  ;;  %v1816_v52 = vld [vmem:[%s2088_s14] sm:$0x3]  ;;  %s2302_s14 = sand.u32 1, %s1904_s18  }
 0x592   : > { %v976_v32 = vmul.f32 %v1807_v29, %v975_v33  ;;  %v1699_v33 = vld [vmem:[%s2377_s5] sm:$0xff]  ;;  %s1573_s22 = sshll.u32 %s2302_s14, 1  ;;  %s1430_s1 = scalar_lea.sflag [#allocation3], %s2302_s14 }
 0x594   : > { %v977_v35 = vadd.f32 %v1807_v29, %v976_v32 }
 0x595   : > { %v1809_v38 = vpop.eup %1808 }
 0x596   : > { %v981_v39 = vsel %vm980_vm4, %v1807_v29, %v977_v35  ;;  %v1145_v40 = vmul.f32 %v1809_v38, %v1143_v31  ;;  %vm1150_vm6 = vweird.f32 %v1809_v38  ;;  %v1698_v29 = vld [vmem:[%s2376_s4 + $0x8] sm:$0xff]  ;;  %v1697_v31 = vld [vmem:[%s2376_s4] sm:$0xff] }
 0x597   : > { %v986_v18 = vsel %vm983_vm5, %v985_v42, %v981_v39  ;;  %vm1151_vm9 = vmor %vm1149_vm8, %vm1150_vm6  ;;  %1315 = vmatpush.bf16.msrb.mxu3 %v1698_v29 }
 0x598   : > { %v1146_v43 = vsub.f32 1.0, %v1145_v40  ;;  %v987_v44 = vmul.f32 %v2241_v28, %v986_v18  ;;  %v1156_v28 = vor.u32 1.1754944e-38, %v1155_v51 }
 0x59a   : > { %v1147_v46 = vmul.f32 %v1809_v38, %v1146_v43  ;;  %v988_v48 = vpack.c.bf16 %v987_v44, %v987_v44 }
 0x59b   : > { %1316 = vmatpush.bf16.msrb.mxu3 %v1697_v31  ;;  %v1776_v31 = vld [vmem:[%s2378_s6] ss:$0 sm:$0xff] }
 0x59c   : > { %v1148_v50 = vadd.f32 %v1809_v38, %v1147_v46 }
 0x59e   : > { %v992_v45 = vpop.permute.xlu1 %991  ;;  %v1152_v53 = vsel %vm1151_vm9, %v1809_v38, %v1148_v50 }
 0x59f   : > { %v997_v34 = vsel %vm650_vm7, %v992_v45, 0  ;;  %v1157_v54 = vsel %vm1154_vm10, %v1156_v28, %v1152_v53  ;;  %v1327_v53 = vunpack.c.l.bf16 %v1816_v52  ;;  %v1817_v28 = vld [vmem:[%s2096_s25] sm:$0xf]  ;;  %s1572_s25 = sshll.u32 %s2302_s14, 2 }
 0x5a0   : > { %1006 = vmatpush.bf16.msrb.mxu2 %v997_v34  ;;  %v1158_v55 = vmul.f32 %v2245_v41, %v1157_v54  ;;  %v1292_v54 = vunpack.c.l.bf16 %v1817_v28  ;;  %s394_s13 = scalar_lea.vmem [#allocation2], %s1572_s25 }
 0x5a1   : > { %v1163_v47 = vpop.permute.xlu0 %1162  ;;  %s1447_s2 = sshll.u32 %s394_s13, 4  ;;  %s1448_s2 = int_to_ptr.vmem [resolvable:$true] %s1447_s2 }
 0x5a2   : > { %v1168_v49 = vsel %vm650_vm7, %v1163_v47, 0  ;;  %v1159_v57 = vpack.c.bf16 %v1158_v55, %v1158_v55 }
 0x5a3   : > { %1649 = vmatmul.msk.bf16.vlgmr.msrb.gmra.mxu2 %vm598_vm2, %v988_v48 }
 0x5a4   : > { %1177 = vmatpush.bf16.msra.mxu2 %v1168_v49 }
 0x5a8   : > { %1349 = vmatpush.bf16.msrb.mxu2 %v1700_v30 }
 0x5a9   : > { %v892_v11 = vpop.permute.xlu0 %891 }
 0x5aa   : > { %v910_v12 = vadd.f32 %v2267_v22, %v892_v11 }
 0x5ac   : > { %1350 = vmatpush.bf16.msrb.mxu2 %v1699_v33 }
 0x5b1   : > { %v1234_v25 = vpop.permute.xlu0 %1233 }
 0x5b3   : > { %1653 = vmatmul.msk.bf16.vlgmr.msra.gmra.mxu2 %vm598_vm2, %v1159_v57 }
 0x5c9   : > { %v1214_v58 = vpop.xlane.xlu1 %1213 }
 0x5ca   : > { %1810 = vrcp.f32 %v1214_v58  ;;  %v1226_v56 = vand.u32 2147483648, %v1214_v58  ;;  %v1224_v1 = vand.u32 2147483647, %v1214_v58  ;;  %vm1220_vm12 = vweird.f32 %v1214_v58 }
 0x5cc   : > { %v1080_v37 = vpop.f32.mrf.mxu1  ;;  %v1227_v4 = vor.u32 1.1754944e-38, %v1226_v56  ;;  %vm1225_vm14 = vcmp.eq.f32.partialorder %v1224_v1, 8.507059e+37 }
 0x5cd   : > { %v1081_v19 = vadd.f32 %v1080_v37, %v1063_v17 }
 0x5d0   : > { %v1811_v59 = vpop.eup %1810 }
 0x5d1   : > { %v1216_v60 = vmul.f32 %v1811_v59, %v1214_v58  ;;  %vm1221_vm11 = vweird.f32 %v1811_v59 }
 0x5d2   : > { %vm1222_vm13 = vmor %vm1220_vm12, %vm1221_vm11 }
 0x5d3   : > { %v1217_v61 = vsub.f32 1.0, %v1216_v60 }
 0x5d4   : > { %v1082_v63 = vpop.f32.mrf.mxu1 }
 0x5d5   : > { %v1218_v0 = vmul.f32 %v1811_v59, %v1217_v61  ;;  %v1356_v61 = vlaneseq }
 0x5d7   : > { %v1219_v2 = vadd.f32 %v1811_v59, %v1218_v0  ;;  %v1357_v56 = vand.u32 127, %v1356_v61 }
 0x5d9   : > { %v1223_v5 = vsel %vm1222_vm13, %v1811_v59, %v1219_v2 }
 0x5da   : > { %v1228_v41 = vsel %vm1225_vm14, %v1227_v4, %v1223_v5  ;;  %v1929_v4 = vmov 0.0  }
 0x5db   : > { %v1229_v6 = vmul.f32 %v2261_v3, %v1228_v41 }
 0x5dc   : > { %v737_v62 = vpop.f32.mrf.mxu2 }
 0x5dd   : > { %v1230_v9 = vpack.c.bf16 %v1229_v6, %v1229_v6 }
 0x5df   : > { %1655 = vmatmul.msk.bf16.vlgmr.msrb.gmra.mxu1 %vm598_vm2, %v1230_v9 }
 0x5e1   : > { %v720_v36 = vpop.permute.xlu1 %719 }
 0x5e2   : > { %v738_v42 = vadd.f32 %v737_v62, %v720_v36  ;;  %v1777_v36 = vld [vmem:[%s2379_s7] ss:$0 sm:$0xff] }
 0x5e4   : > { %v739_v10 = vpop.f32.mrf.mxu2 }
 0x5ec   : > { %v836_v14 = vpop.f32.mrf.mxu2 }
 0x5ed   : > { %v1761_v15 = vpack.i.bf16 %v836_v14, %v910_v12 }
 0x5ef   : > { %1762 = vrot.lane.b32.xlu2 %v1761_v15, %s1926_s23  ;;  %s1677_s23 = sshll.u32 %s2011_s21, 2 }
 0x5f0   : > { %s1445_s24 = scalar_lea.hbm %s2382_s10, %s1677_s23  ;;  %s401_s23 = scalar_lea.vmem [#allocation4], %s1573_s22 }
 0x5f1   : > { %s1449_s15 = sshll.u32 %s1445_s24, 4  ;;  %s1461_s0 = sshll.u32 %s401_s23, 4  ;;  %s1450_s15 = int_to_ptr.hbm [resolvable:$true] %s1449_s15  ;;  %s2326_s0 = int_to_ptr.vmem [resolvable:$true] %s1461_s0 }
 0x5f2   : > { %s1832_s25 = sshra.s32 %s1450_s15, 4  ;;  %s1833_s25 = int_to_ptr.hbm [resolvable:$true] %s1832_s25 }
 0x5f3   : > { %s1834_s29 = scalar_lea.hbm %s1833_s25, 4  ;;  %p1839_p0 = scmp.lt.s32.totalorder %s1833_s25, %s2382_s10 }
 0x5f4   : > { %v838_v16 = vpop.f32.mrf.mxu2  ;;  %p1835_p11 = scmp.ne.s32.totalorder %s1833_s25, %s1834_s29  ;;  %p1840_p1 = scmp.lt.s32.totalorder %s1838_s19, %s1834_s29 }
 0x5f6   : > { %p1836_p12 = pnand %p1835_p11, %p2028_p5  ;;  %p1841_p2 = por %p1840_p1, %p1839_p0 }
 0x5f8   : > { %p1837_p13 = pneg %p1836_p12 }
 0x5fa   : > { %p1842_p3 = pnand %p1841_p2, %p1837_p13 }
 0x626   : > { %v1008_v20 = vpop.f32.mrf.mxu2 }
 0x627   : > { %v1766_v21 = vpack.i.bf16 %v1008_v20, %v1081_v19 }
 0x629   : > { %1767 = vrot.lane.b32.xlu0 %v1766_v21, %s1927_s26 }
 0x62e   : > { %v1010_v3 = vpop.f32.mrf.mxu2 }
 0x636   : > { %v1179_v23 = vpop.f32.mrf.mxu2 }
 0x63e   : > { %v1181_v24 = vpop.f32.mrf.mxu2 }
 0x649   : > { %v1763_v32 = vpop.permute.xlu2 %1762 }
 0x64a   : > { %v1765_v38 = vunpack.i.h.bf16 %v1763_v32  ;;  %v1764_v13 = vunpack.i.l.bf16 %v1763_v32 }
 0x64c   : > { %v1267_v43 = vsel %vm598_vm2, %v2178_v7, %v1765_v38  ;;  %v1284_v44 = vsel %vm598_vm2, %v738_v42, %v1764_v13  ;;  %vm1358_vm2 = vcmp.lt.s32.totalorder %v1357_v56, 32  ;;  %v1778_v38 = vld [vmem:[%s2380_s8] ss:$0 sm:$0xff] }
 0x64d   : > { %v1674_v5 = vsel %vm1358_vm2, 1.0, %v1929_v4  ;;  %v1779_v42 = vld [vmem:[%s2381_s9] ss:$0 sm:$0xff] }
 0x65c   : > { %v1251_v8 = vpop.f32.mrf.mxu1 }
 0x65d   : > { %v1252_v26 = vadd.f32 %v1251_v8, %v1234_v25 }
 0x65f   : > { %v1771_v27 = vpack.i.bf16 %v1179_v23, %v1252_v26 }
 0x661   : > { %1772 = vrot.lane.b32.xlu2 %v1771_v27, %s1928_s12 }
 0x664   : > { %v1253_v22 = vpop.f32.mrf.mxu1 }
 0x69b   : > { %v1768_v35 = vpop.permute.xlu0 %1767 }
 0x69c   : > { %v1770_v39 = vunpack.i.h.bf16 %v1768_v35  ;;  %v1769_v40 = vunpack.i.l.bf16 %v1768_v35 }
 0x69e   : > { %v1269_v34 = vsel %vm1268_vm15, %v1267_v43, %v1770_v39  ;;  %v1285_v47 = vsel %vm1268_vm15, %v1284_v44, %v1769_v40 }
 0x6bb   : > { %v1773_v18 = vpop.permute.xlu2 %1772 }
 0x6bc   : > { %v1775_v45 = vunpack.i.h.bf16 %v1773_v18  ;;  %v1774_v46 = vunpack.i.l.bf16 %v1773_v18 }
 0x6be   : > { %v1271_v48 = vsel %vm1270_vm0, %v1269_v34, %v1775_v45  ;;  %v1286_v49 = vsel %vm1270_vm0, %v1285_v47, %v1774_v46 }
 0x6bf   : > { %v1287_v50 = vpack.c.bf16 %v1271_v48, %v1271_v48  ;;  %v1322_v51 = vpack.c.bf16 %v1286_v49, %v1286_v49 }
 0x6c1   : > { %1664 = vmatmul.msk.bf16.vlgmr.msrb.gmra.mxu3 %vm1305_vm1, %v1287_v50  ;;  %1673 = vmatmul.msk.bf16.vlgmr.msrb.gmra.mxu2 %vm1305_vm1, %v1322_v51 }
 0x744   : > { %v1318_v55 = vpop.f32.mrf.mxu3  ;;  %v1352_v57 = vpop.f32.mrf.mxu2 }
 0x745   : > { %v1319_v7 = vadd.f32 %v1318_v55, %v1292_v54  ;;  %v1353_v58 = vadd.f32 %v1352_v57, %v1327_v53 }
 0x747   : > { %1363 = vadd.xlane.f32.xlu2 %v1319_v7  ;;  %v1396_v37 = vsel %vm650_vm7, %v1353_v58, 0.0 }
 0x748   : > { %1397 = vadd.xlane.f32.xlu0 %v1396_v37 }
 0x74c   : > { %v1320_v59 = vpop.f32.mrf.mxu3  ;;  %v1354_v60 = vpop.f32.mrf.mxu2 }
 0x7ba   : > { %v1364_v63 = vpop.xlane.xlu2 %1363 }
 0x7bb   : > { %v1365_v0 = vmul.f32 0.03125, %v1364_v63  ;;  %v1398_v1 = vpop.xlane.xlu0 %1397 }
 0x7bc   : > { %v1399_v2 = vmul.f32 0.03125, %v1398_v1 }
 0x7bd   : > { %v1366_v41 = vsub.f32 %v1319_v7, %v1365_v0 }
 0x7be   : > { %v1400_v6 = vsub.f32 %v1353_v58, %v1399_v2 }
 0x7bf   : > { %v1367_v62 = vmul.f32 %v1674_v5, %v1366_v41 }
 0x7c0   : > { %v1401_v9 = vmul.f32 %v1674_v5, %v1400_v6 }
 0x7c1   : > { %v1368_v10 = vmul.f32 %v1367_v62, %v1367_v62 }
 0x7c2   : > { %v1402_v11 = vmul.f32 %v1401_v9, %v1401_v9 }
 0x7c3   : > { %1369 = vadd.xlane.f32.xlu1 %v1368_v10 }
 0x7c4   : > { %v1403_v12 = vsel %vm650_vm7, %v1402_v11, 0.0 }
 0x7c5   : > { %1404 = vadd.xlane.f32.xlu0 %v1403_v12 }
 0x836   : > { %v1370_v14 = vpop.xlane.xlu1 %1369 }
 0x837   : > { %v1371_v15 = vmul.f32 0.03125, %v1370_v14 }
 0x838   : > { %v1405_v16 = vpop.xlane.xlu0 %1404 }
 0x839   : > { %v1372_v17 = vadd.f32 1e-06, %v1371_v15  ;;  %v1406_v19 = vmul.f32 0.03125, %v1405_v16 }
 0x83b   : > { %1812 = vrsqrt.f32 %v1372_v17  ;;  %v1407_v20 = vadd.f32 1e-06, %v1406_v19  ;;  %vm1379_vm3 = vweird.f32 %v1372_v17 }
 0x83d   : > { %1814 = vrsqrt.f32 %v1407_v20  ;;  %vm1414_vm6 = vweird.f32 %v1407_v20 }
 0x841   : > { %v1813_v21 = vpop.eup %1812 }
 0x842   : > { %v1374_v3 = vmul.f32 %v1813_v21, %v1372_v17  ;;  %vm1380_vm7 = vweird.f32 %v1813_v21 }
 0x843   : > { %v1815_v23 = vpop.eup %1814  ;;  %vm1381_vm5 = vmor %vm1379_vm3, %vm1380_vm7 }
 0x844   : > { %v1375_v24 = vmul.f32 %v1813_v21, %v1374_v3  ;;  %v1409_v25 = vmul.f32 %v1815_v23, %v1407_v20  ;;  %vm1415_vm4 = vweird.f32 %v1815_v23 }
 0x845   : > { %vm1416_vm8 = vmor %vm1414_vm6, %vm1415_vm4 }
 0x846   : > { %v1376_v8 = vmul.f32 0.5, %v1375_v24  ;;  %v1410_v26 = vmul.f32 %v1815_v23, %v1409_v25 }
 0x848   : > { %v1377_v27 = vsub.f32 1.5, %v1376_v8  ;;  %v1411_v22 = vmul.f32 0.5, %v1410_v26 }
 0x84a   : > { %v1378_v29 = vmul.f32 %v1813_v21, %v1377_v27  ;;  %v1412_v30 = vsub.f32 1.5, %v1411_v22 }
 0x84c   : > { %v1382_v33 = vsel %vm1381_vm5, %v1813_v21, %v1378_v29  ;;  %v1413_v32 = vmul.f32 %v1815_v23, %v1412_v30 }
 0x84d   : > { %v1383_v35 = vmul.f32 %v1382_v33, %v1367_v62 }
 0x84e   : > { %v1417_v13 = vsel %vm1416_vm8, %v1815_v23, %v1413_v32 }
 0x84f   : > { %v1418_v39 = vmul.f32 %v1417_v13, %v1401_v9  ;;  %v1387_v40 = vmul.f32 %v1776_v31, %v1383_v35 }
 0x851   : > { %v1391_v18 = vadd.f32 %v1777_v36, %v1387_v40  ;;  %v1422_v43 = vmul.f32 %v1778_v38, %v1418_v39 }
 0x853   : > { %v1392_v44 = vpack.c.bf16 %v1391_v18, %v1391_v18  ;;  %v1426_v45 = vadd.f32 %v1779_v42, %v1422_v43 }
 0x855   : > { %1393 = vst [vmem:[%s394_s13] sm:$0xf] %v1392_v44  ;;  %v1427_v46 = vpack.c.bf16 %v1426_v45, %v1426_v45 }
 0x856   : > { %1845 = shalt.err (!%p1842_p3)
}
 0x857   : > { %1701 = dma.vmem_to_hbm [thread:$0]  (%p2028_p5), %s1448_s2, 64, %s1450_s15, %s1430_s1   ;;  %1428 = vst [vmem:[%s401_s23] sm:$0x3] %v1427_v46 }
 0x858   : > { %s1435_s21 = scalar_lea.sflag [#allocation5], %s2302_s14  ;;  %s1860_s30 = sshra.s32 %s2328_s16, 4  ;;  %s1861_s30 = int_to_ptr.hbm [resolvable:$true] %s1860_s30 }
 0x859   : > { %s1862_s13 = scalar_lea.hbm %s1861_s30, 2  ;;  %s1866_s22 = scalar_lea.hbm %s2383_s11, 4 }
 0x85a   : > { %p1863_p4 = scmp.ne.s32.totalorder %s1861_s30, %s1862_s13  ;;  %p1867_p9 = scmp.lt.s32.totalorder %s1861_s30, %s2383_s11 }
 0x85b   : > { %p1868_p10 = scmp.lt.s32.totalorder %s1866_s22, %s1862_s13 }
 0x85c   : > { %p1864_p7 = pnand %p1863_p4, %p2028_p5 }
 0x85d   : > { %p1869_p11 = por %p1868_p10, %p1867_p9 }
 0x85e   : > { %p1865_p8 = pneg %p1864_p7 }
 0x860   : > { %p1870_p12 = pnand %p1869_p11, %p1865_p8 }
 0x862   : > { %1873 = shalt.err (!%p1870_p12)
}
 0x863   : > { %1702 = dma.vmem_to_hbm [thread:$0]  (%p2028_p5), %s2326_s0, 32, %s2328_s16, %s1435_s21  }
 0x864 PF: > { %p1712_p13 = scmp.ge.s32.totalorder %s1912_s20, 2  ;;  %s1475_s2 = sand.u32 1, %s1900_s17  }
 0x865   : > { %s1476_s14 = scalar_lea.sflag [#allocation3], %s1475_s2 }
 0x866   : > { %p1706_p0 = pnand %p1712_p13, %p2032_p6 }
 0x868   : > { %p1707_p1 = pneg %p1706_p0 }
 0x86a   : > { %1891 = dma.done.wait (%p1707_p1), %s1476_s14, 64  }
 0x86b   : > { %1893 = vsyncadd (%p1707_p1), %s1476_s14, 4294967232  ;;  %s1486_s15 = scalar_lea.sflag [#allocation5], %s1475_s2 }
 0x86c   : > { %1895 = dma.done.wait (%p1707_p1), %s1486_s15, 32  }
 0x86d   : > { %1897 = vsyncadd (%p1707_p1), %s1486_s15, 4294967264  ;;  %s2398_s20 = sld [smem:[#allocation9_spill]]  ;;  %s2401_s17 = smov %s1904_s18 }
 0x86e   : > { %s2399_s27 = sld [smem:[#allocation8_spill]] }
 0x86f   : > { %s2400_s19 = sld [smem:[#allocation10_spill]] }
 0x873   : > { %p25_p5 = scmp.ge.s32.totalorder %s2398_s20, 4  }
 0x874   : > { %s2402_s18 = smov %s2399_s27 }
 0x875   :  { %27 = sbr.rel (!%p25_p5) target bundleno = 9 (0x9), region = 115 }
 0x87a   :  { %1492 = vsyncpa [#allocation3], 1 }
 0x87b   :  { %1494 = vsyncpa [#allocation3 + $0x1], 1 }
 0x87c   :  { %1495 = vsyncpa [#allocation5], 1 }
 0x87d   :  { %1497 = vsyncpa [#allocation5 + $0x1], 1 }

</bundles_post_ra>
